<compile_context>
chip_gen: v5e
topology: v5e:2x2
jax: 0.10.0
libtpu: 0.0.40
codegen_flags: <defaults>
</compile_context>

<pallas_src>
import functools

import jax
import jax.numpy as jnp
from jax.experimental import pallas as pl
from jax.experimental.pallas import tpu as pltpu


_EPS = 1e-5


def _gelu_exact(x):
    # PyTorch nn.GELU() default (erf form).
    return 0.5 * x * (1.0 + jax.lax.erf(x * (1.0 / jnp.sqrt(2.0).astype(x.dtype))))


# ----------------------------- fused kernel ----------------------------------

def _fused_mixer_kernel(x_ref, g1_ref, b1_ref, w1a_ref, b1a_ref, w1b_ref, b1b_ref,
                        g2_ref, b2_ref, w2aT_ref, b2aT_ref, w2bT_ref, b2bT_ref,
                        wbig_ref, bias_ref, o_ref, *, batch, height):
    cw = x_ref.shape[1]
    x = x_ref[...].astype(jnp.float32)                        # [B*H, C*W]

    # ---- branch 1: LayerNorm over (c w) + Linear -> GELU -> Linear.
    #      Batch folded into the matmul M dimension (rows = (b, h)).
    mu1 = jnp.mean(x, axis=-1, keepdims=True)
    var1 = jnp.mean(jnp.square(x - mu1), axis=-1, keepdims=True)
    xn1 = (x - mu1) * jax.lax.rsqrt(var1 + _EPS) * g1_ref[...] + b1_ref[...]
    h1 = _gelu_exact(jnp.dot(xn1, w1a_ref[...],
                             preferred_element_type=jnp.float32) + b1a_ref[...])
    y1 = jnp.dot(h1, w1b_ref[...],
                 preferred_element_type=jnp.float32) + b1b_ref[...]      # [B*H, C*W]

    # ---- branch 2: LayerNorm over h + Linear -> GELU -> Linear, computed in
    #      transposed form so the lane dim stays (b, c, w)-dense (128 lanes).
    #      Batch folded into the lane (N) dimension of both matmuls.
    x2 = jnp.concatenate(
        [x[i * height:(i + 1) * height, :] for i in range(batch)], axis=1)  # [H, B*C*W]
    mu2 = jnp.mean(x2, axis=0, keepdims=True)
    var2 = jnp.mean(jnp.square(x2 - mu2), axis=0, keepdims=True)
    xn2 = (x2 - mu2) * jax.lax.rsqrt(var2 + _EPS) * g2_ref[...] + b2_ref[...]
    h2 = _gelu_exact(jnp.dot(w2aT_ref[...], xn2,
                             preferred_element_type=jnp.float32) + b2aT_ref[...])  # [4H, B*C*W]
    y2c = jnp.dot(w2bT_ref[...], h2,
                  preferred_element_type=jnp.float32) + b2bT_ref[...]               # [H, B*C*W]
    y2 = jnp.concatenate(
        [y2c[:, i * cw:(i + 1) * cw] for i in range(batch)], axis=0)        # [B*H, C*W]

    # ---- branch sum + 1x1 conv (kron-expanded, lane-dense) + (conv bias + time MLP)
    xc = y1 + y2
    out = jnp.dot(xc, wbig_ref[...],
                  preferred_element_type=jnp.float32) + bias_ref[...]       # [B*H, Do*W]
    o_ref[...] = out.astype(o_ref.dtype)


# ----------------------------- wrapper ----------------------------------------

def small_mixer_block(x, time_emb, p):
    """Forward pass of SmallMixerBlock. x: [b,c,h,w] NCHW -> [b,dim_out,h,w]."""
    b, c, h, w = x.shape
    cw = c * w
    dim_out = p["wconv"].shape[1]

    # Single shared input layout: rows = (b, h), lanes = (c, w).
    x_rows = x.transpose(0, 2, 1, 3).reshape(b * h, cw)

    # Time MLP (Mish + Linear) hoisted out of the kernel; folded into the conv bias
    # and expanded to the kernel's row/lane layout.
    tm = time_emb * jnp.tanh(jax.nn.softplus(time_emb))
    tv = jnp.dot(tm, p["wt"]) + p["bt"]                              # [b, dim_out]
    bias = jnp.repeat(p["bconv"] + tv, w, axis=-1)                   # [b, dim_out*w]
    bias_rows = jnp.repeat(bias, h, axis=0)                          # [b*h, dim_out*w]

    # Kron-expanded 1x1 conv weight: W_big[c*W+ww', d*W+ww] = wconv[c,d] * (ww'==ww),
    # so the conv becomes one dense lane-dense matmul in the kernel.
    w_big = jnp.kron(p["wconv"], jnp.eye(w, dtype=p["wconv"].dtype))  # [c*w, dim_out*w]

    out_rows = pl.pallas_call(
        functools.partial(_fused_mixer_kernel, batch=b, height=h),
        out_shape=jax.ShapeDtypeStruct((b * h, dim_out * w), x.dtype),
        compiler_params=pltpu.CompilerParams(vmem_limit_bytes=32 * 1024 * 1024),
    )(x_rows,
      p["ln1_g"], p["ln1_b"], p["w1a"], p["b1a"], p["w1b"], p["b1b"],
      p["ln2_g"].T, p["ln2_b"].T, p["w2a"].T, p["b2a"].T, p["w2b"].T, p["b2b"].T,
      w_big, bias_rows)

    # [b*h, dim_out*w] -> [b, dim_out, h, w]  (pure reshape + one cheap transpose)
    return out_rows.reshape(b, h, dim_out, w).transpose(0, 2, 1, 3)


# ----------------------------- params / reference ----------------------------

def init_params(key, height, width, channels, dim_out, time_emb_dim):
    cw = channels * width
    h1 = 4 * channels
    h2 = 4 * height
    ks = jax.random.split(key, 10)

    def lin(k, fan_in, fan_out):
        s = 1.0 / jnp.sqrt(fan_in)
        kw, kb = jax.random.split(k)
        wgt = jax.random.uniform(kw, (fan_in, fan_out), jnp.float32, -s, s)
        bia = jax.random.uniform(kb, (1, fan_out), jnp.float32, -s, s)
        return wgt, bia

    w1a, b1a = lin(ks[0], cw, h1)
    w1b, b1b = lin(ks[1], h1, cw)
    w2a, b2a = lin(ks[2], height, h2)
    w2b, b2b = lin(ks[3], h2, height)
    wt, bt = lin(ks[4], time_emb_dim, dim_out)
    if channels != dim_out:
        wconv, bconv = lin(ks[5], channels, dim_out)     # 1x1 conv as matmul
    else:
        wconv = jnp.eye(channels, dtype=jnp.float32)     # nn.Identity
        bconv = jnp.zeros((1, channels), jnp.float32)

    return dict(
        ln1_g=jnp.ones((1, cw), jnp.float32), ln1_b=jnp.zeros((1, cw), jnp.float32),
        ln2_g=jnp.ones((1, height), jnp.float32), ln2_b=jnp.zeros((1, height), jnp.float32),
        w1a=w1a, b1a=b1a, w1b=w1b, b1b=b1b,
        w2a=w2a, b2a=b2a, w2b=w2b, b2b=b2b,
        wconv=wconv, bconv=bconv, wt=wt, bt=bt,
    )


def reference(x, time_emb, p):
    b, c, h, w = x.shape

    def gelu(z):
        return 0.5 * z * (1.0 + jax.lax.erf(z / jnp.sqrt(2.0)))

    def ln(z, g, bb, eps=1e-5):
        mu = z.mean(-1, keepdims=True)
        var = jnp.square(z - mu).mean(-1, keepdims=True)
        return (z - mu) / jnp.sqrt(var + eps) * g + bb

    x1 = x.transpose(0, 2, 1, 3).reshape(b, h, c * w)
    x1 = ln(x1, p["ln1_g"][0], p["ln1_b"][0])
    x1 = gelu(x1 @ p["w1a"] + p["b1a"][0]) @ p["w1b"] + p["b1b"][0]
    x1 = x1.reshape(b, h, c, w).transpose(0, 2, 1, 3)

    x2 = x.transpose(0, 1, 3, 2).reshape(b, c * w, h)
    x2 = ln(x2, p["ln2_g"][0], p["ln2_b"][0])
    x2 = gelu(x2 @ p["w2a"] + p["b2a"][0]) @ p["w2b"] + p["b2b"][0]
    x2 = x2.reshape(b, c, w, h).transpose(0, 1, 3, 2)

    xc = x1 + x2
    y = jnp.einsum("bchw,cd->bdhw", xc, p["wconv"]) + p["bconv"][0][None, :, None, None]
    tm = time_emb * jnp.tanh(jax.nn.softplus(time_emb))
    tv = tm @ p["wt"] + p["bt"][0]
    return y + tv[:, :, None, None]


# ----------------------------- main -------------------------------------------

if __name__ == "__main__":
    B, C, H, W = 2, 4, 16, 16
    DIM_OUT, T_DIM = 8, 32

    key = jax.random.PRNGKey(0)
    kx, kt, kp = jax.random.split(key, 3)
    x = jax.random.normal(kx, (B, C, H, W), jnp.float32)
    time_emb = jax.random.normal(kt, (B, T_DIM), jnp.float32)
    params = init_params(kp, H, W, C, DIM_OUT, T_DIM)

    out = small_mixer_block(x, time_emb, params)
    out = jax.block_until_ready(out)

    ref = jax.block_until_ready(reference(x, time_emb, params))
    assert out.shape == (B, DIM_OUT, H, W), out.shape
    assert jnp.allclose(out, ref, atol=1e-4, rtol=1e-4), float(jnp.max(jnp.abs(out - ref)))

    print("KERNEL_OK")
</pallas_src>

<mosaic_0001>
module attributes {stable_mosaic.version = 11 : i64} {
  func.func @_fused_mixer_kernel(%arg0: memref<32x64xf32, #tpu.memory_space<vmem>>, %arg1: memref<1x64xf32, #tpu.memory_space<vmem>>, %arg2: memref<1x64xf32, #tpu.memory_space<vmem>>, %arg3: memref<64x16xf32, #tpu.memory_space<vmem>>, %arg4: memref<1x16xf32, #tpu.memory_space<vmem>>, %arg5: memref<16x64xf32, #tpu.memory_space<vmem>>, %arg6: memref<1x64xf32, #tpu.memory_space<vmem>>, %arg7: memref<16x1xf32, #tpu.memory_space<vmem>>, %arg8: memref<16x1xf32, #tpu.memory_space<vmem>>, %arg9: memref<64x16xf32, #tpu.memory_space<vmem>>, %arg10: memref<64x1xf32, #tpu.memory_space<vmem>>, %arg11: memref<16x64xf32, #tpu.memory_space<vmem>>, %arg12: memref<16x1xf32, #tpu.memory_space<vmem>>, %arg13: memref<64x128xf32, #tpu.memory_space<vmem>>, %arg14: memref<32x128xf32, #tpu.memory_space<vmem>>, %arg15: memref<32x128xf32, #tpu.memory_space<vmem>>) attributes {dimension_semantics = [], scalar_prefetch = 0 : i64, scratch_operands = 0 : i64, tpu.core_type = #tpu.core_type<tc>} {
    %c0 = arith.constant 0 : index
    %c0_0 = arith.constant 0 : index
    %0 = vector.load %arg0[%c0, %c0_0] : memref<32x64xf32, #tpu.memory_space<vmem>>, vector<32x64xf32>
    %cst = arith.constant dense<0.000000e+00> : vector<32xf32>
    %1 = vector.multi_reduction <add>, %0, %cst [1] : vector<32x64xf32> to vector<32xf32>
    %2 = vector.shape_cast %1 : vector<32xf32> to vector<32x1xf32>
    %cst_1 = arith.constant 6.400000e+01 : f32
    %3 = vector.broadcast %cst_1 : f32 to vector<32x1xf32>
    %4 = arith.divf %2, %3 : vector<32x1xf32>
    %5 = vector.broadcast %4 : vector<32x1xf32> to vector<32x64xf32>
    %6 = arith.subf %0, %5 : vector<32x64xf32>
    %7 = arith.mulf %6, %6 : vector<32x64xf32>
    %cst_2 = arith.constant dense<0.000000e+00> : vector<32xf32>
    %8 = vector.multi_reduction <add>, %7, %cst_2 [1] : vector<32x64xf32> to vector<32xf32>
    %9 = vector.shape_cast %8 : vector<32xf32> to vector<32x1xf32>
    %cst_3 = arith.constant 6.400000e+01 : f32
    %10 = vector.broadcast %cst_3 : f32 to vector<32x1xf32>
    %11 = arith.divf %9, %10 : vector<32x1xf32>
    %12 = vector.broadcast %4 : vector<32x1xf32> to vector<32x64xf32>
    %13 = arith.subf %0, %12 : vector<32x64xf32>
    %cst_4 = arith.constant 9.99999974E-6 : f32
    %14 = vector.broadcast %cst_4 : f32 to vector<32x1xf32>
    %15 = arith.addf %11, %14 : vector<32x1xf32>
    %16 = math.rsqrt %15 : vector<32x1xf32>
    %17 = vector.broadcast %16 : vector<32x1xf32> to vector<32x64xf32>
    %18 = arith.mulf %13, %17 : vector<32x64xf32>
    %c0_5 = arith.constant 0 : index
    %c0_6 = arith.constant 0 : index
    %19 = vector.load %arg1[%c0_5, %c0_6] : memref<1x64xf32, #tpu.memory_space<vmem>>, vector<1x64xf32>
    %20 = vector.broadcast %19 : vector<1x64xf32> to vector<32x64xf32>
    %21 = arith.mulf %18, %20 : vector<32x64xf32>
    %c0_7 = arith.constant 0 : index
    %c0_8 = arith.constant 0 : index
    %22 = vector.load %arg2[%c0_7, %c0_8] : memref<1x64xf32, #tpu.memory_space<vmem>>, vector<1x64xf32>
    %23 = vector.broadcast %22 : vector<1x64xf32> to vector<32x64xf32>
    %24 = arith.addf %21, %23 : vector<32x64xf32>
    %c0_9 = arith.constant 0 : index
    %c0_10 = arith.constant 0 : index
    %25 = vector.load %arg3[%c0_9, %c0_10] : memref<64x16xf32, #tpu.memory_space<vmem>>, vector<64x16xf32>
    %cst_11 = arith.constant dense<0.000000e+00> : vector<32x16xf32>
    %26 = tpu.matmul %24, %25, %cst_11 {dimension_numbers = #tpu.dot_dimension_numbers<[1], [0], [0], [1], [0, 0, 1, 1], [], []>} : vector<32x64xf32>, vector<64x16xf32>, vector<32x16xf32> -> vector<32x16xf32>
    %c0_12 = arith.constant 0 : index
    %c0_13 = arith.constant 0 : index
    %27 = vector.load %arg4[%c0_12, %c0_13] : memref<1x16xf32, #tpu.memory_space<vmem>>, vector<1x16xf32>
    %28 = vector.broadcast %27 : vector<1x16xf32> to vector<32x16xf32>
    %29 = arith.addf %26, %28 : vector<32x16xf32>
    %cst_14 = arith.constant 5.000000e-01 : f32
    %30 = vector.broadcast %cst_14 : f32 to vector<32x16xf32>
    %31 = arith.mulf %30, %29 : vector<32x16xf32>
    %cst_15 = arith.constant 2.000000e+00 : f32
    %32 = math.sqrt %cst_15 : f32
    %cst_16 = arith.constant 1.000000e+00 : f32
    %33 = arith.divf %cst_16, %32 : f32
    %34 = vector.broadcast %33 : f32 to vector<32x16xf32>
    %35 = arith.mulf %29, %34 : vector<32x16xf32>
    %36 = math.erf %35 : vector<32x16xf32>
    %cst_17 = arith.constant 1.000000e+00 : f32
    %37 = vector.broadcast %cst_17 : f32 to vector<32x16xf32>
    %38 = arith.addf %37, %36 : vector<32x16xf32>
    %39 = arith.mulf %31, %38 : vector<32x16xf32>
    %c0_18 = arith.constant 0 : index
    %c0_19 = arith.constant 0 : index
    %40 = vector.load %arg5[%c0_18, %c0_19] : memref<16x64xf32, #tpu.memory_space<vmem>>, vector<16x64xf32>
    %cst_20 = arith.constant dense<0.000000e+00> : vector<32x64xf32>
    %41 = tpu.matmul %39, %40, %cst_20 {dimension_numbers = #tpu.dot_dimension_numbers<[1], [0], [0], [1], [0, 0, 1, 1], [], []>} : vector<32x16xf32>, vector<16x64xf32>, vector<32x64xf32> -> vector<32x64xf32>
    %c0_21 = arith.constant 0 : index
    %c0_22 = arith.constant 0 : index
    %42 = vector.load %arg6[%c0_21, %c0_22] : memref<1x64xf32, #tpu.memory_space<vmem>>, vector<1x64xf32>
    %43 = vector.broadcast %42 : vector<1x64xf32> to vector<32x64xf32>
    %44 = arith.addf %41, %43 : vector<32x64xf32>
    %45 = vector.extract_strided_slice %0 {offsets = [0, 0], sizes = [16, 64], strides = [1, 1]} : vector<32x64xf32> to vector<16x64xf32>
    %46 = vector.extract_strided_slice %0 {offsets = [16, 0], sizes = [16, 64], strides = [1, 1]} : vector<32x64xf32> to vector<16x64xf32>
    %47 = tpu.concatenate %45, %46 in 1 : vector<16x64xf32>, vector<16x64xf32> -> vector<16x128xf32>
    %cst_23 = arith.constant dense<0.000000e+00> : vector<128xf32>
    %48 = vector.multi_reduction <add>, %47, %cst_23 [0] : vector<16x128xf32> to vector<128xf32>
    %49 = vector.shape_cast %48 : vector<128xf32> to vector<1x128xf32>
    %cst_24 = arith.constant 1.600000e+01 : f32
    %50 = vector.broadcast %cst_24 : f32 to vector<1x128xf32>
    %51 = arith.divf %49, %50 : vector<1x128xf32>
    %52 = vector.broadcast %51 : vector<1x128xf32> to vector<16x128xf32>
    %53 = arith.subf %47, %52 : vector<16x128xf32>
    %54 = arith.mulf %53, %53 : vector<16x128xf32>
    %cst_25 = arith.constant dense<0.000000e+00> : vector<128xf32>
    %55 = vector.multi_reduction <add>, %54, %cst_25 [0] : vector<16x128xf32> to vector<128xf32>
    %56 = vector.shape_cast %55 : vector<128xf32> to vector<1x128xf32>
    %cst_26 = arith.constant 1.600000e+01 : f32
    %57 = vector.broadcast %cst_26 : f32 to vector<1x128xf32>
    %58 = arith.divf %56, %57 : vector<1x128xf32>
    %59 = vector.broadcast %51 : vector<1x128xf32> to vector<16x128xf32>
    %60 = arith.subf %47, %59 : vector<16x128xf32>
    %cst_27 = arith.constant 9.99999974E-6 : f32
    %61 = vector.broadcast %cst_27 : f32 to vector<1x128xf32>
    %62 = arith.addf %58, %61 : vector<1x128xf32>
    %63 = math.rsqrt %62 : vector<1x128xf32>
    %64 = vector.broadcast %63 : vector<1x128xf32> to vector<16x128xf32>
    %65 = arith.mulf %60, %64 : vector<16x128xf32>
    %c0_28 = arith.constant 0 : index
    %c0_29 = arith.constant 0 : index
    %66 = vector.load %arg7[%c0_28, %c0_29] : memref<16x1xf32, #tpu.memory_space<vmem>>, vector<16x1xf32>
    %67 = vector.broadcast %66 : vector<16x1xf32> to vector<16x128xf32>
    %68 = arith.mulf %65, %67 : vector<16x128xf32>
    %c0_30 = arith.constant 0 : index
    %c0_31 = arith.constant 0 : index
    %69 = vector.load %arg8[%c0_30, %c0_31] : memref<16x1xf32, #tpu.memory_space<vmem>>, vector<16x1xf32>
    %70 = vector.broadcast %69 : vector<16x1xf32> to vector<16x128xf32>
    %71 = arith.addf %68, %70 : vector<16x128xf32>
    %c0_32 = arith.constant 0 : index
    %c0_33 = arith.constant 0 : index
    %72 = vector.load %arg9[%c0_32, %c0_33] : memref<64x16xf32, #tpu.memory_space<vmem>>, vector<64x16xf32>
    %cst_34 = arith.constant dense<0.000000e+00> : vector<64x128xf32>
    %73 = tpu.matmul %72, %71, %cst_34 {dimension_numbers = #tpu.dot_dimension_numbers<[1], [0], [0], [1], [0, 0, 1, 1], [], []>} : vector<64x16xf32>, vector<16x128xf32>, vector<64x128xf32> -> vector<64x128xf32>
    %c0_35 = arith.constant 0 : index
    %c0_36 = arith.constant 0 : index
    %74 = vector.load %arg10[%c0_35, %c0_36] : memref<64x1xf32, #tpu.memory_space<vmem>>, vector<64x1xf32>
    %75 = vector.broadcast %74 : vector<64x1xf32> to vector<64x128xf32>
    %76 = arith.addf %73, %75 : vector<64x128xf32>
    %cst_37 = arith.constant 5.000000e-01 : f32
    %77 = vector.broadcast %cst_37 : f32 to vector<64x128xf32>
    %78 = arith.mulf %77, %76 : vector<64x128xf32>
    %cst_38 = arith.constant 2.000000e+00 : f32
    %79 = math.sqrt %cst_38 : f32
    %cst_39 = arith.constant 1.000000e+00 : f32
    %80 = arith.divf %cst_39, %79 : f32
    %81 = vector.broadcast %80 : f32 to vector<64x128xf32>
    %82 = arith.mulf %76, %81 : vector<64x128xf32>
    %83 = math.erf %82 : vector<64x128xf32>
    %cst_40 = arith.constant 1.000000e+00 : f32
    %84 = vector.broadcast %cst_40 : f32 to vector<64x128xf32>
    %85 = arith.addf %84, %83 : vector<64x128xf32>
    %86 = arith.mulf %78, %85 : vector<64x128xf32>
    %c0_41 = arith.constant 0 : index
    %c0_42 = arith.constant 0 : index
    %87 = vector.load %arg11[%c0_41, %c0_42] : memref<16x64xf32, #tpu.memory_space<vmem>>, vector<16x64xf32>
    %cst_43 = arith.constant dense<0.000000e+00> : vector<16x128xf32>
    %88 = tpu.matmul %87, %86, %cst_43 {dimension_numbers = #tpu.dot_dimension_numbers<[1], [0], [0], [1], [0, 0, 1, 1], [], []>} : vector<16x64xf32>, vector<64x128xf32>, vector<16x128xf32> -> vector<16x128xf32>
    %c0_44 = arith.constant 0 : index
    %c0_45 = arith.constant 0 : index
    %89 = vector.load %arg12[%c0_44, %c0_45] : memref<16x1xf32, #tpu.memory_space<vmem>>, vector<16x1xf32>
    %90 = vector.broadcast %89 : vector<16x1xf32> to vector<16x128xf32>
    %91 = arith.addf %88, %90 : vector<16x128xf32>
    %92 = vector.extract_strided_slice %91 {offsets = [0, 0], sizes = [16, 64], strides = [1, 1]} : vector<16x128xf32> to vector<16x64xf32>
    %93 = vector.extract_strided_slice %91 {offsets = [0, 64], sizes = [16, 64], strides = [1, 1]} : vector<16x128xf32> to vector<16x64xf32>
    %94 = tpu.concatenate %92, %93 in 0 : vector<16x64xf32>, vector<16x64xf32> -> vector<32x64xf32>
    %95 = arith.addf %44, %94 : vector<32x64xf32>
    %c0_46 = arith.constant 0 : index
    %c0_47 = arith.constant 0 : index
    %96 = vector.load %arg13[%c0_46, %c0_47] : memref<64x128xf32, #tpu.memory_space<vmem>>, vector<64x128xf32>
    %cst_48 = arith.constant dense<0.000000e+00> : vector<32x128xf32>
    %97 = tpu.matmul %95, %96, %cst_48 {dimension_numbers = #tpu.dot_dimension_numbers<[1], [0], [0], [1], [0, 0, 1, 1], [], []>} : vector<32x64xf32>, vector<64x128xf32>, vector<32x128xf32> -> vector<32x128xf32>
    %c0_49 = arith.constant 0 : index
    %c0_50 = arith.constant 0 : index
    %98 = vector.load %arg14[%c0_49, %c0_50] : memref<32x128xf32, #tpu.memory_space<vmem>>, vector<32x128xf32>
    %99 = arith.addf %97, %98 : vector<32x128xf32>
    %c0_51 = arith.constant 0 : index
    %c0_52 = arith.constant 0 : index
    %100 = vector.load %arg15[%c0_51, %c0_52] : memref<32x128xf32, #tpu.memory_space<vmem>>, vector<32x128xf32>
    tpu.vector_store %arg15[%c0_51, %c0_52], %99 {strides = array<i32>} : memref<32x128xf32, #tpu.memory_space<vmem>>, vector<32x128xf32>,
    return
  }
}

</mosaic_0001>

<bundles_post_ra>
// kernel: tpu_custom_call.1
= control target key start
LH: loop header
LB: loop body
LE: loop exit
PB: predicated region body
PF: predicated region fallthrough
CT: control target
= control target key end

     0   :  { %vm55_vm0 = vcmask 523264   ;;  %s1247_s22 = smov 64   ;;  %v1248_v4 = vmov 0   ;;  %s2075_s0 = inlined_call_operand.vmem [shape: f32[32,64], index: 0, kind: input, shape index: {}]   ;;  %s2076_s1 = inlined_call_operand.vmem [shape: f32[1,64], index: 1, kind: input, shape index: {}]   ;;  %s2077_s2 = inlined_call_operand.vmem [shape: f32[1,64], index: 2, kind: input, shape index: {}]   ;;  %s2078_s3 = inlined_call_operand.vmem [shape: f32[64,16], index: 3, kind: input, shape index: {}]   ;;  %s2079_s4 = inlined_call_operand.vmem [shape: f32[1,16], index: 4, kind: input, shape index: {}]   ;;  %s2080_s5 = inlined_call_operand.vmem [shape: f32[16,64], index: 5, kind: input, shape index: {}]   ;;  %s2081_s6 = inlined_call_operand.vmem [shape: f32[1,64], index: 6, kind: input, shape index: {}]   ;;  %s2082_s7 = inlined_call_operand.vmem [shape: f32[16,1], index: 7, kind: input, shape index: {}]   ;;  %s2083_s8 = inlined_call_operand.vmem [shape: f32[16,1], index: 8, kind: input, shape index: {}]   ;;  %s2084_s9 = inlined_call_operand.vmem [shape: f32[64,16], index: 9, kind: input, shape index: {}]   ;;  %s2085_s10 = inlined_call_operand.vmem [shape: f32[64,1], index: 10, kind: input, shape index: {}]   ;;  %s2086_s11 = inlined_call_operand.vmem [shape: f32[16,64], index: 11, kind: input, shape index: {}]   ;;  %s2087_s12 = inlined_call_operand.vmem [shape: f32[16,1], index: 12, kind: input, shape index: {}]   ;;  %s2088_s13 = inlined_call_operand.vmem [shape: f32[64,128], index: 13, kind: input, shape index: {}]   ;;  %s2089_s14 = inlined_call_operand.vmem [shape: f32[32,128], index: 14, kind: input, shape index: {}]   ;;  %s2090_s15 = inlined_call_operand.hbm [shape: f32[32,128], index: 15, kind: output, shape index: {}]  }
   0x1   :  { %v53_v0 = vld [vmem:[%s2075_s0 + $0x10] sm:$0xff]  ;;  %v51_v1 = vld [vmem:[%s2075_s0] sm:$0xff]  ;;  %1177 = vset.pattern.permute.xlu1 %v1248_v4  ;;  %1176 = vset.pattern.permute.xlu0 %v1248_v4  ;;  %v52_v5 = vld [vmem:[%s2075_s0 + $0x8] sm:$0xff] }
   0x2   :  { %446 = vrot.lane.b32.xlu0 %v53_v0, %s1247_s22  ;;  %v62_v2 = vsel %vm55_vm0, %v53_v0, 0.0  ;;  %v56_v3 = vsel %vm55_vm0, %v51_v1, 0.0  ;;  %1178 = vset.pattern.permute.xlu2 %v1248_v4 }
   0x3   :  { %63 = vadd.xlane.f32.xlu2 %v62_v2  ;;  %57 = vadd.xlane.f32.xlu1 %v56_v3 }
   0x4   :  { %20 = vsyncpa [#allocation3], 0  ;;  %v54_v6 = vld [vmem:[%s2075_s0 + $0x18] sm:$0xff]  ;;  %v59_v7 = vsel %vm55_vm0, %v52_v5, 0.0  ;;  %v495_v9 = vld [vmem:[%s2082_s7 + $0x8] sm:$0xff]  ;;  %v1249_v13 = vmov 64.0  }
   0x5   :  { %v65_v8 = vsel %vm55_vm0, %v54_v6, 0.0  ;;  %v508_v10 = vld [vmem:[%s2083_s8] sm:$0xff]  ;;  %v509_v11 = vld [vmem:[%s2083_s8 + $0x8] sm:$0xff]  ;;  %1183 = vrcp.f32 %v1249_v13  ;;  %v1250_v19 = vmov 16.0   ;;  %v174_v58 = vld [vmem:[%s2078_s3 + $0x38] sm:$0xff]  ;;  %vm402_vm6 = vcmask 130048  }
   0x6   :  { %v494_v12 = vld [vmem:[%s2082_s7] sm:$0xff]  ;;  %1185 = vrcp.f32 %v1250_v19  ;;  %199 = vmatpush.msra.mxu0 %v174_v58  ;;  %v173_v62 = vld [vmem:[%s2078_s3 + $0x30] sm:$0xff]  ;;  %v172_v63 = vld [vmem:[%s2078_s3 + $0x28] sm:$0xff]  ;;  %s1251_s8 = smov [#allocation2]   ;;  %s1113_s20 = sshll.u32 %s2090_s15, 4  ;;  %s1114_s20 = int_to_ptr.hbm [resolvable:$true] %s1113_s20 }
   0x7   :  { %v171_v4 = vld [vmem:[%s2078_s3 + $0x20] sm:$0xff]  ;;  %s1252_s24 = smov 128   ;;  %s1253_s25 = smov 8  }
   0x8   :  { %200 = vmatpush.msra.mxu0 %v173_v62 }
   0xa   :  { %448 = vrot.lane.b32.xlu0 %v54_v6, %s1247_s22  ;;  %201 = vmatpush.msra.mxu0 %v172_v63 }
   0xb   :  { %60 = vadd.xlane.f32.xlu1 %v59_v7  ;;  %66 = vadd.xlane.f32.xlu2 %v65_v8  ;;  %v1184_v14 = vpop.eup %1183  ;;  %v170_v7 = vld [vmem:[%s2078_s3 + $0x18] sm:$0xff] }
   0xc   :  { %v69_v15 = vmul.f32 64.0, %v1184_v14  ;;  %vm73_vm1 = vweird.f32 %v1184_v14  ;;  %v1186_v22 = vpop.eup %1185  ;;  %202 = vmatpush.msra.mxu0 %v171_v4 }
   0xd   :  { %v462_v29 = vmul.f32 16.0, %v1186_v22  ;;  %vm466_vm2 = vweird.f32 %v1186_v22 }
   0xe   :  { %v70_v16 = vsub.f32 1.0, %v69_v15  ;;  %203 = vmatpush.msra.mxu0 %v170_v7 }
   0xf   :  { %v463_v34 = vsub.f32 1.0, %v462_v29  ;;  %v531_v29 = vld [vmem:[%s2085_s10 + $0x8] sm:$0xff] }
  0x10   :  { %v71_v17 = vmul.f32 %v1184_v14, %v70_v16  ;;  %v533_v16 = vld [vmem:[%s2085_s10 + $0x18] sm:$0xff] }
  0x11   :  { %v464_v44 = vmul.f32 %v1186_v22, %v463_v34 }
  0x12   :  { %503 = vperm.xlu0 %1176, %v495_v9   ;;  %v72_v18 = vadd.f32 %v1184_v14, %v71_v17  ;;  %v169_v9 = vld [vmem:[%s2078_s3 + $0x10] sm:$0xff] }
  0x13   :  { %v465_v50 = vadd.f32 %v1186_v22, %v464_v44  ;;  %204 = vmatpush.msra.mxu0 %v169_v9 }
  0x14   :  { %v1364_v21 = vsel %vm73_vm1, %v1184_v14, %v72_v18  ;;  %v167_v14 = vld [vmem:[%s2078_s3] sm:$0xff]  ;;  %v532_v18 = vld [vmem:[%s2085_s10 + $0x10] sm:$0xff] }
  0x15   :  { %v467_v55 = vsel %vm466_vm2, %v1186_v22, %v465_v50  ;;  %v535_v22 = vld [vmem:[%s2085_s10 + $0x28] sm:$0xff]  ;;  %v525_v50 = vld [vmem:[%s2084_s9 + $0x18] sm:$0xff] }
  0x1a   :  { %512 = vperm.xlu0 %1176, %v508_v10   ;;  %v534_v10 = vld [vmem:[%s2085_s10 + $0x20] sm:$0xff] }
  0x23   :  { %517 = vperm.xlu2 %1178, %v509_v11  }
  0x24   :  { %498 = vperm.xlu1 %1177, %v494_v12   ;;  %v168_v12 = vld [vmem:[%s2078_s3 + $0x8] sm:$0xff] }
  0x25   :  { %205 = vmatpush.msra.mxu0 %v168_v12 }
  0x27   :  { %206 = vmatpush.msra.mxu0 %v167_v14 }
  0x74   :  { %v447_v20 = vpop.permute.xlu0 %446 }
  0x75   :  { %v452_v30 = vsel %vm55_vm0, %v51_v1, %v447_v20 }
  0x76   :  { %v64_v23 = vpop.xlane.xlu2 %63  ;;  %v58_v24 = vpop.xlane.xlu1 %57 }
  0x77   :  { %v77_v25 = vmul.f32 %v1364_v21, %v64_v23  ;;  %v75_v26 = vmul.f32 %v1364_v21, %v58_v24  ;;  %v530_v23 = vld [vmem:[%s2085_s10] sm:$0xff] }
  0x78   :  { %v997_v24 = vld [vmem:[%s2087_s12] sm:$0xff] }
  0x79   :  { %v1368_v27 = vsub.f32 %v53_v0, %v77_v25  ;;  %v1370_v28 = vsub.f32 %v51_v1, %v75_v26  ;;  %v537_v0 = vld [vmem:[%s2085_s10 + $0x38] sm:$0xff] }
  0x7b   :  { %v85_v31 = vmul.f32 %v1368_v27, %v1368_v27  ;;  %v83_v32 = vmul.f32 %v1370_v28, %v1370_v28 }
  0x7c   :  { %v449_v33 = vpop.permute.xlu0 %448 }
  0x7d   :  { %v453_v35 = vsel %vm55_vm0, %v52_v5, %v449_v33  ;;  %v93_v36 = vsel %vm55_vm0, %v85_v31, 0.0  ;;  %v87_v37 = vsel %vm55_vm0, %v83_v32, 0.0 }
  0x7e   :  { %v454_v38 = vadd.f32 %v453_v35, %v452_v30  ;;  %94 = vadd.xlane.f32.xlu1 %v93_v36  ;;  %88 = vadd.xlane.f32.xlu0 %v87_v37  ;;  %v61_v39 = vpop.xlane.xlu1 %60  ;;  %v67_v40 = vpop.xlane.xlu2 %66 }
  0x7f   :  { %v76_v41 = vmul.f32 %v1364_v21, %v61_v39  ;;  %v78_v42 = vmul.f32 %v1364_v21, %v67_v40 }
  0x80   :  { %v455_v43 = vrot.slane %v454_v38, 4 }
  0x81   :  { %v1382_v45 = vsub.f32 %v52_v5, %v76_v41  ;;  %v1384_v47 = vsub.f32 %v54_v6, %v78_v42  ;;  %v536_v6 = vld [vmem:[%s2085_s10 + $0x30] sm:$0xff] }
  0x82   :  { %v456_v46 = vadd.f32 %v455_v43, %v454_v38 }
  0x83   :  { %v84_v48 = vmul.f32 %v1382_v45, %v1382_v45  ;;  %v86_v53 = vmul.f32 %v1384_v47, %v1384_v47 }
  0x84   :  { %v457_v49 = vrot.slane %v456_v46, 2  ;;  %v504_v31 = vpop.permute.xlu0 %503 }
  0x85   :  { %v90_v51 = vsel %vm55_vm0, %v84_v48, 0.0  ;;  %v96_v57 = vsel %vm55_vm0, %v86_v53, 0.0  ;;  %v523_v48 = vld [vmem:[%s2084_s9 + $0x8] sm:$0xff]  ;;  %v528_v53 = vld [vmem:[%s2084_s9 + $0x30] sm:$0xff] }
  0x86   :  { %v458_v52 = vadd.f32 %v457_v49, %v456_v46  ;;  %91 = vadd.xlane.f32.xlu2 %v90_v51  ;;  %v518_v42 = vpop.permute.xlu2 %517  ;;  %v524_v49 = vld [vmem:[%s2084_s9 + $0x10] sm:$0xff]  ;;  %v526_v51 = vld [vmem:[%s2084_s9 + $0x20] sm:$0xff] }
  0x88   :  { %v459_v54 = vrot.slane %v458_v52, 1 }
  0x8a   :  { %v460_v56 = vadd.f32 %v459_v54, %v458_v52  ;;  %v527_v52 = vld [vmem:[%s2084_s9 + $0x28] sm:$0xff]  ;;  %v529_v54 = vld [vmem:[%s2084_s9 + $0x38] sm:$0xff] }
  0x8c   :  { %v468_v59 = vmul.f32 %v467_v55, %v460_v56  ;;  %v513_v43 = vpop.permute.xlu0 %512 }
  0x8e   :  { %v469_v60 = vsub.f32 %v452_v30, %v468_v59  ;;  %v470_v61 = vsub.f32 %v453_v35, %v468_v59  ;;  %97 = vadd.xlane.f32.xlu2 %v96_v57  ;;  %v998_v35 = vld [vmem:[%s2087_s12 + $0x8] sm:$0xff] }
  0x90   :  { %v471_v1 = vmul.f32 %v469_v60, %v469_v60  ;;  %v472_v2 = vmul.f32 %v470_v61, %v470_v61 }
  0x92   :  { %v473_v3 = vadd.f32 %v472_v2, %v471_v1  ;;  %575 = vperm.xlu0 %1176, %v537_v0  }
  0x94   :  { %v474_v5 = vrot.slane %v473_v3, 4 }
  0x96   :  { %v475_v8 = vadd.f32 %v474_v5, %v473_v3  ;;  %v499_v37 = vpop.permute.xlu1 %498 }
  0x97   :  { %570 = vperm.xlu1 %1177, %v536_v6  }
  0x98   :  { %v476_v11 = vrot.slane %v475_v8, 2 }
  0x9a   :  { %v477_v13 = vadd.f32 %v476_v11, %v475_v8  ;;  %560 = vperm.xlu0 %1176, %v534_v10  }
  0x9c   :  { %v478_v15 = vrot.slane %v477_v13, 1 }
  0x9e   :  { %v479_v17 = vadd.f32 %v478_v15, %v477_v13  ;;  %v1179_v15 = vld [vmem:[%s2076_s1] ss:$0 sm:$0xff] }
  0x9f   :  { %555 = vperm.xlu1 %1177, %v533_v16  }
  0xa0   :  { %v480_v19 = vmul.f32 %v479_v17, %v467_v55 }
  0xa2   :  { %v481_v20 = vadd.f32 1e-05, %v480_v19  ;;  %550 = vperm.xlu0 %1176, %v532_v18  }
  0xa4   :  { %1187 = vrsqrt.f32 %v481_v20  ;;  %vm488_vm3 = vweird.f32 %v481_v20 }
  0xa6   :  { %565 = vperm.xlu2 %1178, %v535_v22  }
  0xa7   :  { %540 = vperm.xlu1 %1177, %v530_v23  }
  0xaa   :  { %v1188_v25 = vpop.eup %1187  ;;  %1001 = vperm.xlu0 %1176, %v997_v24  }
  0xab   :  { %v483_v26 = vmul.f32 %v1188_v25, %v481_v20  ;;  %vm489_vm4 = vweird.f32 %v1188_v25 }
  0xac   :  { %vm490_vm5 = vmor %vm488_vm3, %vm489_vm4 }
  0xad   :  { %v484_v30 = vmul.f32 %v1188_v25, %v483_v26 }
  0xae   :  { %545 = vperm.xlu2 %1178, %v531_v29  }
  0xaf   :  { %v485_v32 = vmul.f32 0.5, %v484_v30 }
  0xb1   :  { %v486_v33 = vsub.f32 1.5, %v485_v32 }
  0xb3   :  { %v487_v34 = vmul.f32 %v1188_v25, %v486_v33 }
  0xb5   :  { %v491_v36 = vsel %vm490_vm5, %v1188_v25, %v487_v34 }
  0xb6   :  { %v493_v38 = vmul.f32 %v491_v36, %v470_v61  ;;  %1006 = vperm.xlu2 %1178, %v998_v35   ;;  %v492_v39 = vmul.f32 %v491_v36, %v469_v60 }
  0xb8   :  { %v507_v40 = vmul.f32 %v504_v31, %v493_v38  ;;  %v506_v41 = vmul.f32 %v499_v37, %v492_v39 }
  0xba   :  { %v521_v44 = vadd.f32 %v518_v42, %v507_v40  ;;  %v520_v46 = vadd.f32 %v513_v43, %v506_v41 }
  0xbc   :  { %616 = vmatpush.msrb.mxu0 %v521_v44  ;;  %1159 = vmatpush.msra.mxu2 %v521_v44 }
  0xbe   :  { %617 = vmatpush.msrb.mxu0 %v520_v46  ;;  %1160 = vmatpush.msra.mxu2 %v520_v46 }
  0xbf   :  { %1138 = vmatmul.msk.f32.vlgmr.msra.gmra.mxu2 %vm402_vm6, %v523_v48 }
  0xc7   :  { %1139 = vmatmul.msk.f32.gmra.mxu2 %vm402_vm6, %v524_v49 }
  0xcf   :  { %1140 = vmatmul.msk.f32.gmra.mxu2 %vm402_vm6, %v525_v50 }
  0xd7   :  { %1141 = vmatmul.msk.f32.gmra.mxu2 %vm402_vm6, %v526_v51 }
  0xdf   :  { %1142 = vmatmul.msk.f32.gmra.mxu2 %vm402_vm6, %v527_v52 }
  0xe7   :  { %1143 = vmatmul.msk.f32.gmra.mxu2 %vm402_vm6, %v528_v53 }
  0xef   :  { %1144 = vmatmul.msk.f32.gmra.mxu2 %vm402_vm6, %v529_v54 }
  0xf1   :  { %v89_v55 = vpop.xlane.xlu0 %88  ;;  %v95_v56 = vpop.xlane.xlu1 %94 }
  0xf2   :  { %v99_v57 = vmul.f32 %v89_v55, %v1364_v21  ;;  %v101_v58 = vmul.f32 %v95_v56, %v1364_v21 }
  0xf4   :  { %v103_v59 = vadd.f32 1e-05, %v99_v57  ;;  %v105_v60 = vadd.f32 1e-05, %v101_v58 }
  0xf6   :  { %1189 = vrsqrt.f32 %v103_v59  ;;  %vm113_vm8 = vweird.f32 %v103_v59  ;;  %vm133_vm10 = vweird.f32 %v105_v60 }
  0xf7   :  { %1191 = vrsqrt.f32 %v105_v60 }
  0xf9   :  { %v92_v61 = vpop.xlane.xlu2 %91 }
  0xfa   :  { %v100_v62 = vmul.f32 %v92_v61, %v1364_v21 }
  0xfc   :  { %v1190_v63 = vpop.eup %1189  ;;  %v104_v0 = vadd.f32 1e-05, %v100_v62 }
  0xfd   :  { %v1192_v1 = vpop.eup %1191  ;;  %v108_v2 = vmul.f32 %v1190_v63, %v103_v59  ;;  %vm114_vm7 = vweird.f32 %v1190_v63 }
  0xfe   :  { %v128_v3 = vmul.f32 %v1192_v1, %v105_v60  ;;  %1193 = vrsqrt.f32 %v104_v0  ;;  %vm115_vm9 = vmor %vm113_vm8, %vm114_vm7  ;;  %vm134_vm11 = vweird.f32 %v1192_v1  ;;  %vm123_vm14 = vweird.f32 %v104_v0 }
  0xff   :  { %v109_v4 = vmul.f32 %v1190_v63, %v108_v2  ;;  %vm135_vm13 = vmor %vm133_vm10, %vm134_vm11 }
 0x100   :  { %v129_v6 = vmul.f32 %v1192_v1, %v128_v3 }
 0x101   :  { %v110_v5 = vmul.f32 0.5, %v109_v4  ;;  %v98_v7 = vpop.xlane.xlu2 %97 }
 0x102   :  { %v102_v8 = vmul.f32 %v98_v7, %v1364_v21  ;;  %v130_v13 = vmul.f32 0.5, %v129_v6  ;;  %v1180_v21 = vld [vmem:[%s2077_s2] ss:$0 sm:$0xff] }
 0x103   :  { %v111_v9 = vsub.f32 1.5, %v110_v5 }
 0x104   :  { %v1194_v10 = vpop.eup %1193  ;;  %v106_v11 = vadd.f32 1e-05, %v102_v8  ;;  %v131_v19 = vsub.f32 1.5, %v130_v13  ;;  %v1496_v46 = vpop.permute.xlu0 %575 }
 0x105   :  { %v112_v12 = vmul.f32 %v1190_v63, %v111_v9  ;;  %v118_v14 = vmul.f32 %v1194_v10, %v104_v0  ;;  %vm124_vm12 = vweird.f32 %v1194_v10 }
 0x106   :  { %1195 = vrsqrt.f32 %v106_v11  ;;  %v132_v26 = vmul.f32 %v1192_v1, %v131_v19  ;;  %vm125_vm15 = vmor %vm123_vm14, %vm124_vm12  ;;  %vm143_vm1 = vweird.f32 %v106_v11 }
 0x107   :  { %v116_v16 = vsel %vm115_vm9, %v1190_v63, %v112_v12  ;;  %v119_v17 = vmul.f32 %v1194_v10, %v118_v14 }
 0x108   :  { %v147_v18 = vmul.f32 %v116_v16, %v1370_v28  ;;  %v136_v33 = vsel %vm135_vm13, %v1192_v1, %v132_v26 }
 0x109   :  { %v120_v20 = vmul.f32 0.5, %v119_v17  ;;  %v149_v38 = vmul.f32 %v136_v33, %v1368_v27  ;;  %v522_v27 = vld [vmem:[%s2084_s9] sm:$0xff]  ;;  %v566_v48 = vpop.permute.xlu2 %565  ;;  %v1498_v51 = vpop.permute.xlu1 %570 }
 0x10a   :  { %v155_v22 = vmul.f32 %v1179_v15, %v147_v18 }
 0x10b   :  { %v121_v23 = vsub.f32 1.5, %v120_v20  ;;  %v157_v40 = vmul.f32 %v1179_v15, %v149_v38 }
 0x10c   :  { %v1196_v24 = vpop.eup %1195  ;;  %v163_v25 = vadd.f32 %v1180_v21, %v155_v22  ;;  %v561_v49 = vpop.permute.xlu0 %560 }
 0x10d   :  { %v122_v29 = vmul.f32 %v1194_v10, %v121_v23  ;;  %v138_v30 = vmul.f32 %v1196_v24, %v106_v11  ;;  %vm144_vm2 = vweird.f32 %v1196_v24  ;;  %v165_v42 = vadd.f32 %v1180_v21, %v157_v40 }
 0x10e   :  { %1125 = vmatmul.msk.f32.vlgmr.msra.gmra.mxu0 %vm55_vm0, %v163_v25  ;;  %vm145_vm3 = vmor %vm143_vm1, %vm144_vm2 }
 0x10f   :  { %v126_v28 = vsel %vm125_vm15, %v1194_v10, %v122_v29  ;;  %v139_v31 = vmul.f32 %v1196_v24, %v138_v30 }
 0x110   :  { %v148_v32 = vmul.f32 %v126_v28, %v1382_v45 }
 0x111   :  { %v140_v34 = vmul.f32 0.5, %v139_v31  ;;  %v556_v60 = vpop.permute.xlu1 %555 }
 0x112   :  { %v156_v35 = vmul.f32 %v1179_v15, %v148_v32 }
 0x113   :  { %v141_v36 = vsub.f32 1.5, %v140_v34 }
 0x114   :  { %v164_v37 = vadd.f32 %v1180_v21, %v156_v35  ;;  %v551_v52 = vpop.permute.xlu0 %550 }
 0x115   :  { %v142_v39 = vmul.f32 %v1196_v24, %v141_v36 }
 0x116   :  { %1126 = vmatmul.msk.f32.gmra.mxu0 %vm55_vm0, %v164_v37 }
 0x117   :  { %v146_v41 = vsel %vm145_vm3, %v1196_v24, %v142_v39 }
 0x118   :  { %v150_v43 = vmul.f32 %v146_v41, %v1384_v47  ;;  %v546_v47 = vpop.permute.xlu2 %545 }
 0x11a   :  { %v158_v45 = vmul.f32 %v1179_v15, %v150_v43 }
 0x11c   :  { %v166_v44 = vadd.f32 %v1180_v21, %v158_v45 }
 0x11e   :  { %1127 = vmatmul.msk.f32.gmra.mxu0 %vm55_vm0, %v165_v42 }
 0x126   :  { %1128 = vmatmul.msk.f32.gmra.mxu0 %vm55_vm0, %v166_v44 }
 0x12e   :  { %1137 = vmatmul.msk.f32.vlgmr.msrb.gmra.mxu0 %vm402_vm6, %v522_v27 }
 0x142   :  { %v622_v50 = vpop.f32.mrf.mxu2 }
 0x143   :  { %v1500_v54 = vadd.f32 %v622_v50, %v546_v47 }
 0x145   :  { %v1508_v57 = vmul.f32 0.70710677, %v1500_v54 }
 0x147   :  { %v699_v62 = vmul.f32 %v1508_v57, %v1508_v57 }
 0x149   :  { %v1523_v4 = vmin.f32 %v699_v62, 16.0 }
 0x14a   :  { %v625_v53 = vpop.f32.mrf.mxu2 }
 0x14b   :  { %v1502_v55 = vadd.f32 %v625_v53, %v551_v52  ;;  %v701_v10 = vmul.f32 2.1237322e-06, %v1523_v4 }
 0x14d   :  { %v1505_v56 = vmul.f32 0.70710677, %v1502_v55  ;;  %v702_v21 = vadd.f32 0.00028619796, %v701_v10 }
 0x14f   :  { %v739_v58 = vmul.f32 %v1505_v56, %v1505_v56  ;;  %v703_v30 = vmul.f32 %v702_v21, %v1523_v4 }
 0x151   :  { %v1512_v59 = vmin.f32 %v739_v58, 16.0  ;;  %v704_v40 = vadd.f32 0.0036580483, %v703_v30 }
 0x152   :  { %v628_v61 = vpop.f32.mrf.mxu2 }
 0x153   :  { %v741_v63 = vmul.f32 2.1237322e-06, %v1512_v59  ;;  %v1517_v0 = vadd.f32 %v628_v61, %v556_v60  ;;  %v752_v1 = vmul.f32 3.8918573e-05, %v1512_v59  ;;  %v705_v58 = vmul.f32 %v704_v40, %v1523_v4 }
 0x155   :  { %v742_v2 = vadd.f32 0.00028619796, %v741_v63  ;;  %v1521_v3 = vmul.f32 0.70710677, %v1517_v0  ;;  %v753_v6 = vadd.f32 0.001143296, %v752_v1 }
 0x157   :  { %v779_v5 = vmul.f32 %v1521_v3, %v1521_v3  ;;  %v743_v7 = vmul.f32 %v742_v2, %v1512_v59  ;;  %v754_v14 = vmul.f32 %v753_v6, %v1512_v59 }
 0x159   :  { %v1528_v8 = vmin.f32 %v779_v5, 16.0  ;;  %v744_v15 = vadd.f32 0.0036580483, %v743_v7  ;;  %v755_v22 = vadd.f32 0.014752088, %v754_v14 }
 0x15a   :  { %v631_v9 = vpop.f32.mrf.mxu2 }
 0x15b   :  { %v1531_v11 = vadd.f32 %v631_v9, %v561_v49  ;;  %v781_v12 = vmul.f32 2.1237322e-06, %v1528_v8  ;;  %v792_v13 = vmul.f32 3.8918573e-05, %v1528_v8  ;;  %v745_v23 = vmul.f32 %v744_v15, %v1512_v59 }
 0x15c   :  { %v756_v34 = vmul.f32 %v755_v22, %v1512_v59  ;;  %v1577_v9 = vmul.f32 0.5, %v1502_v55 }
 0x15d   :  { %v782_v16 = vadd.f32 0.00028619796, %v781_v12  ;;  %v1537_v17 = vmul.f32 0.70710677, %v1531_v11  ;;  %v793_v18 = vadd.f32 0.001143296, %v792_v13 }
 0x15e   :  { %v746_v35 = vadd.f32 0.05243302, %v745_v23  ;;  %v757_v44 = vadd.f32 0.112945676, %v756_v34  ;;  %v706_v13 = vadd.f32 0.05243302, %v705_v58 }
 0x15f   :  { %v819_v19 = vmul.f32 %v1537_v17, %v1537_v17  ;;  %v794_v20 = vmul.f32 %v793_v18, %v1528_v8  ;;  %v783_v24 = vmul.f32 %v782_v16, %v1528_v8  ;;  %v1584_v18 = vmul.f32 0.5, %v1517_v0 }
 0x160   :  { %v747_v27 = vmul.f32 %v746_v35, %v1512_v59  ;;  %v758_v2 = vmul.f32 %v757_v44, %v1512_v59  ;;  %v712_v0 = vmul.f32 3.8918573e-05, %v1523_v4 }
 0x161   :  { %v1544_v25 = vmin.f32 %v819_v19, 16.0  ;;  %v795_v29 = vadd.f32 0.014752088, %v794_v20  ;;  %v784_v37 = vadd.f32 0.0036580483, %v783_v24 }
 0x162   :  { %v634_v26 = vpop.f32.mrf.mxu2  ;;  %v748_v5 = vadd.f32 0.18741608, %v747_v27  ;;  %v759_v55 = vadd.f32 0.4994258, %v758_v2  ;;  %v713_v2 = vadd.f32 0.001143296, %v712_v0 }
 0x163   :  { %v1547_v28 = vadd.f32 %v634_v26, %v566_v48  ;;  %v821_v31 = vmul.f32 2.1237322e-06, %v1544_v25  ;;  %v832_v32 = vmul.f32 3.8918573e-05, %v1544_v25  ;;  %v796_v33 = vmul.f32 %v795_v29, %v1528_v8 }
 0x164   :  { %v785_v50 = vmul.f32 %v784_v37, %v1528_v8  ;;  %v749_v20 = vmul.f32 %v748_v5, %v1512_v59  ;;  %v760_v40 = vmul.f32 %v759_v55, %v1512_v59 }
 0x165   :  { %v1554_v36 = vmul.f32 0.70710677, %v1547_v28  ;;  %v822_v38 = vadd.f32 0.00028619796, %v821_v31  ;;  %v833_v39 = vadd.f32 0.001143296, %v832_v32 }
 0x166   :  { %v797_v42 = vadd.f32 0.112945676, %v796_v33  ;;  %v786_v10 = vadd.f32 0.05243302, %v785_v50 }
 0x167   :  { %v859_v41 = vmul.f32 %v1554_v36, %v1554_v36  ;;  %v823_v43 = vmul.f32 %v822_v38, %v1544_v25  ;;  %v834_v45 = vmul.f32 %v833_v39, %v1544_v25 }
 0x168   :  { %v798_v49 = vmul.f32 %v797_v42, %v1528_v8  ;;  %v787_v26 = vmul.f32 %v786_v10, %v1528_v8  ;;  %v750_v42 = vadd.f32 1.1283791, %v749_v20 }
 0x169   :  { %v1561_v48 = vmin.f32 %v859_v41, 16.0  ;;  %v824_v47 = vadd.f32 0.0036580483, %v823_v43  ;;  %v835_v53 = vadd.f32 0.014752088, %v834_v45  ;;  %v1605_v41 = vmul.f32 %v706_v13, %v1523_v4 }
 0x16a   :  { %v637_v52 = vpop.f32.mrf.mxu2  ;;  %v799_v1 = vadd.f32 0.4994258, %v798_v49  ;;  %v788_v44 = vadd.f32 0.18741608, %v787_v26 }
 0x16b   :  { %v861_v60 = vmul.f32 2.1237322e-06, %v1561_v48  ;;  %v1568_v61 = vadd.f32 %v637_v52, %v1498_v51  ;;  %v872_v62 = vmul.f32 3.8918573e-05, %v1561_v48  ;;  %v836_v63 = vmul.f32 %v835_v53, %v1544_v25 }
 0x16c   :  { %v825_v12 = vmul.f32 %v824_v47, %v1544_v25  ;;  %v800_v19 = vmul.f32 %v799_v1, %v1528_v8  ;;  %v789_v5 = vmul.f32 %v788_v44, %v1528_v8  ;;  %v1636_v8 = vmul.f32 %v750_v42, %v1505_v56 }
 0x16d   :  { %v862_v6 = vadd.f32 0.00028619796, %v861_v60  ;;  %v1574_v7 = vmul.f32 0.70710677, %v1568_v61  ;;  %v873_v51 = vadd.f32 0.001143296, %v872_v62  ;;  %v1647_v56 = vmul.f32 %v713_v2, %v1523_v4 }
 0x16e   :  { %v837_v16 = vadd.f32 0.112945676, %v836_v63  ;;  %v826_v29 = vadd.f32 0.05243302, %v825_v12  ;;  %v1601_v39 = vadd.f32 1.0, %v800_v19  ;;  %v1619_v60 = vadd.f32 1.0, %v760_v40 }
 0x16f   :  { %v863_v14 = vmul.f32 %v862_v6, %v1561_v48  ;;  %v899_v15 = vmul.f32 %v1574_v7, %v1574_v7  ;;  %v874_v21 = vmul.f32 %v873_v51, %v1561_v48  ;;  %v1639_v19 = vmul.f32 0.5, %v1547_v28 }
 0x170   :  { %v838_v24 = vmul.f32 %v837_v16, %v1544_v25  ;;  %1197 = vrcp.f32 %v1601_v39  ;;  %v771_v42 = vand.u32 2147483647, %v1619_v60  ;;  %vm807_vm7 = vweird.f32 %v1601_v39 }
 0x171   :  { %v864_v22 = vadd.f32 0.0036580483, %v863_v14  ;;  %v1589_v23 = vmin.f32 %v899_v15, 16.0  ;;  %v875_v31 = vadd.f32 0.014752088, %v874_v21  ;;  %v1631_v15 = vmul.f32 0.5, %v1531_v11 }
 0x172   :  { %v640_v30 = vpop.f32.mrf.mxu2  ;;  %v839_v38 = vadd.f32 0.4994258, %v838_v24  ;;  %v790_v24 = vadd.f32 1.1283791, %v789_v5  ;;  %v811_v5 = vand.u32 2147483647, %v1601_v39 }
 0x173   :  { %v865_v32 = vmul.f32 %v864_v22, %v1561_v48  ;;  %v901_v33 = vmul.f32 2.1237322e-06, %v1589_v23  ;;  %v1597_v34 = vadd.f32 %v640_v30, %v1496_v46  ;;  %v912_v35 = vmul.f32 3.8918573e-05, %v1589_v23 }
 0x174   :  { %v876_v37 = vmul.f32 %v875_v31, %v1561_v48  ;;  %v827_v46 = vmul.f32 %v826_v29, %v1544_v25  ;;  %v840_v49 = vmul.f32 %v839_v38, %v1544_v25  ;;  %v1664_v44 = vmul.f32 %v790_v24, %v1521_v3 }
 0x175   :  { %v902_v43 = vadd.f32 0.00028619796, %v901_v33  ;;  %v1608_v45 = vmul.f32 0.70710677, %v1597_v34  ;;  %v913_v27 = vadd.f32 0.001143296, %v912_v35 }
 0x176   :  { %v866_v50 = vadd.f32 0.05243302, %v865_v32  ;;  %v877_v52 = vadd.f32 0.112945676, %v876_v37  ;;  %v1616_v58 = vadd.f32 1.0, %v840_v49  ;;  %v1641_v22 = vpop.eup %1197  ;;  %vm1723_vm12 = vcmp.eq.f32.partialorder %v811_v5, 8.507059e+37 }
 0x177   :  { %v903_v47 = vmul.f32 %v902_v43, %v1589_v23  ;;  %v939_v59 = vmul.f32 %v1608_v45, %v1608_v45  ;;  %v914_v53 = vmul.f32 %v913_v27, %v1589_v23  ;;  %v828_v6 = vadd.f32 0.18741608, %v827_v46 }
 0x178   :  { %v878_v1 = vmul.f32 %v877_v52, %v1561_v48  ;;  %1199 = vrcp.f32 %v1616_v58  ;;  %v867_v12 = vmul.f32 %v866_v50, %v1561_v48  ;;  %v803_v40 = vmul.f32 %v1641_v22, %v1601_v39 }
 0x179   :  { %v904_v62 = vadd.f32 0.0036580483, %v903_v47  ;;  %v1621_v63 = vmin.f32 %v939_v59, 16.0  ;;  %v915_v10 = vadd.f32 0.014752088, %v914_v53  ;;  %1201 = vrcp.f32 %v1619_v60 }
 0x17a   :  { %v879_v21 = vadd.f32 0.4994258, %v878_v1  ;;  %v829_v30 = vmul.f32 %v828_v6, %v1544_v25  ;;  %v868_v31 = vadd.f32 0.18741608, %v867_v12  ;;  %v851_v59 = vand.u32 2147483647, %v1616_v58 }
 0x17b   :  { %v905_v51 = vmul.f32 %v904_v62, %v1589_v23  ;;  %v941_v13 = vmul.f32 2.1237322e-06, %v1621_v63  ;;  %v952_v14 = vmul.f32 3.8918573e-05, %v1621_v63  ;;  %v916_v16 = vmul.f32 %v915_v10, %v1589_v23 }
 0x17c   :  { %v880_v11 = vmul.f32 %v879_v21, %v1561_v48  ;;  %v830_v49 = vadd.f32 1.1283791, %v829_v30  ;;  %v869_v50 = vmul.f32 %v868_v31, %v1561_v48  ;;  %v804_v3 = vsub.f32 1.0, %v803_v40 }
 0x17d   :  { %v906_v55 = vadd.f32 0.05243302, %v905_v51  ;;  %v942_v20 = vadd.f32 0.00028619796, %v941_v13  ;;  %v953_v26 = vadd.f32 0.001143296, %v952_v14  ;;  %vm847_vm4 = vweird.f32 %v1616_v58 }
 0x17e   :  { %v917_v29 = vadd.f32 0.112945676, %v916_v16  ;;  %v1649_v32 = vpop.eup %1199  ;;  %v1654_v37 = vadd.f32 1.0, %v880_v11  ;;  %v853_v51 = vand.u32 2147483648, %v1616_v58  ;;  %v831_v13 = vmul.f32 %v830_v49, %v1537_v17 }
 0x17f   :  { %v943_v0 = vmul.f32 %v942_v20, %v1621_v63  ;;  %v907_v28 = vmul.f32 %v906_v55, %v1589_v23  ;;  %v954_v33 = vmul.f32 %v953_v26, %v1621_v63  ;;  %v843_v25 = vmul.f32 %v1649_v32, %v1616_v58  ;;  %v1661_v43 = vpop.eup %1201  ;;  %v1690_v20 = vld [vmem:[%s2079_s4] ss:$0 sm:$0xff] }
 0x180   :  { %v918_v35 = vmul.f32 %v917_v29, %v1589_v23  ;;  %1203 = vrcp.f32 %v1654_v37  ;;  %v1675_v6 = vmul.f32 %v1661_v43, %v1619_v60  ;;  %v870_v14 = vadd.f32 1.1283791, %v869_v50 }
 0x181   :  { %v944_v38 = vadd.f32 0.0036580483, %v943_v0  ;;  %v955_v46 = vadd.f32 0.014752088, %v954_v33  ;;  %v908_v52 = vadd.f32 0.18741608, %v907_v28  ;;  %vm848_vm8 = vweird.f32 %v1649_v32 }
 0x182   :  { %v919_v27 = vadd.f32 0.4994258, %v918_v35  ;;  %v844_v1 = vsub.f32 1.0, %v843_v25  ;;  %vm1694_vm5 = vcmp.eq.f32.partialorder %v851_v59, 8.507059e+37  ;;  %v891_v30 = vand.u32 2147483647, %v1654_v37  ;;  %vm1719_vm11 = vmor %vm847_vm4, %vm848_vm8 }
 0x183   :  { %v945_v47 = vmul.f32 %v944_v38, %v1621_v63  ;;  %v956_v53 = vmul.f32 %v955_v46, %v1621_v63  ;;  %v909_v55 = vmul.f32 %v908_v52, %v1589_v23  ;;  %v854_v0 = vor.u32 1.1754944e-38, %v853_v51 }
 0x184   :  { %v920_v62 = vmul.f32 %v919_v27, %v1589_v23  ;;  %v845_v12 = vmul.f32 %v1649_v32, %v844_v1  ;;  %v805_v23 = vmul.f32 %v1641_v22, %v804_v3  ;;  %v1706_v28 = vmul.f32 %v870_v14, %v1554_v36 }
 0x185   :  { %v946_v2 = vadd.f32 0.05243302, %v945_v47  ;;  %v957_v10 = vadd.f32 0.112945676, %v956_v53  ;;  %vm887_vm9 = vweird.f32 %v1654_v37  ;;  %vm808_vm10 = vweird.f32 %v1641_v22 }
 0x186   :  { %v1677_v48 = vadd.f32 1.0, %v920_v62  ;;  %v1684_v21 = vpop.eup %1203  ;;  %v846_v31 = vadd.f32 %v1649_v32, %v845_v12  ;;  %v910_v38 = vadd.f32 1.1283791, %v909_v55  ;;  %v893_v46 = vand.u32 2147483648, %v1654_v37  ;;  %vm1764_vm15 = vmor %vm807_vm7, %vm808_vm10 }
 0x187   :  { %v947_v16 = vmul.f32 %v946_v2, %v1621_v63  ;;  %v958_v24 = vmul.f32 %v957_v10, %v1621_v63  ;;  %v883_v29 = vmul.f32 %v1684_v21, %v1654_v37  ;;  %v806_v59 = vadd.f32 %v1641_v22, %v805_v23 }
 0x188   :  { %1205 = vrcp.f32 %v1677_v48  ;;  %v850_v47 = vsel %vm1719_vm11, %v1649_v32, %v846_v31  ;;  %v933_v62 = vand.u32 2147483648, %v1677_v48  ;;  %vm1741_vm13 = vcmp.eq.f32.partialorder %v891_v30, 8.507059e+37 }
 0x189   :  { %v948_v26 = vadd.f32 0.18741608, %v947_v16  ;;  %v959_v11 = vadd.f32 0.4994258, %v958_v24  ;;  %v884_v35 = vsub.f32 1.0, %v883_v29  ;;  %vm888_vm14 = vweird.f32 %v1684_v21 }
 0x18a   :  { %v931_v2 = vand.u32 2147483647, %v1677_v48  ;;  %v764_v3 = vsub.f32 1.0, %v1675_v6  ;;  %v855_v12 = vsel %vm1694_vm5, %v854_v0, %v850_v47  ;;  %v1758_v51 = vmul.f32 %v910_v38, %v1574_v7  ;;  %vm1779_vm2 = vmor %vm887_vm9, %vm888_vm14 }
 0x18b   :  { %v208_v33 = vpop.f32.mrf.mxu0  ;;  %v960_v40 = vmul.f32 %v959_v11, %v1621_v63  ;;  %v949_v49 = vmul.f32 %v948_v26, %v1621_v63  ;;  %v885_v50 = vmul.f32 %v1684_v21, %v884_v35  ;;  %v813_v63 = vand.u32 2147483648, %v1601_v39 }
 0x18c   :  { %v1711_v25 = vadd.f32 %v1690_v20, %v208_v33  ;;  %v894_v55 = vor.u32 1.1754944e-38, %v893_v46  ;;  %vm927_vm1 = vweird.f32 %v1677_v48  ;;  %v934_v17 = vor.u32 1.1754944e-38, %v933_v62 }
 0x18d   :  { %v1738_v53 = vadd.f32 1.0, %v960_v40  ;;  %v886_v10 = vadd.f32 %v1684_v21, %v885_v50  ;;  %v950_v14 = vadd.f32 1.1283791, %v949_v49  ;;  %v810_v7 = vsel %vm1764_vm15, %v1641_v22, %v806_v59 }
 0x18e   :  { %v1733_v52 = vpop.eup %1205  ;;  %v1736_v58 = vmul.f32 0.70710677, %v1711_v25  ;;  %v856_v23 = vmul.f32 %v855_v12, %v831_v13  ;;  %v814_v11 = vor.u32 1.1754944e-38, %v813_v63  ;;  %v765_v30 = vmul.f32 %v1661_v43, %v764_v3 }
 0x18f   :  { %v923_v32 = vmul.f32 %v1733_v52, %v1677_v48  ;;  %1207 = vrcp.f32 %v1738_v53  ;;  %vm1789_vm3 = vcmp.eq.f32.partialorder %v931_v2, 8.507059e+37  ;;  %v890_v37 = vsel %vm1779_vm2, %v1684_v21, %v886_v10 }
 0x190   :  { %v228_v5 = vmul.f32 %v1736_v58, %v1736_v58  ;;  %v951_v13 = vmul.f32 %v950_v14, %v1608_v45  ;;  %v971_v35 = vand.u32 2147483647, %v1738_v53  ;;  %v973_v38 = vand.u32 2147483648, %v1738_v53 }
 0x191   :  { %v924_v16 = vsub.f32 1.0, %v923_v32  ;;  %v815_v40 = vsel %vm1723_vm12, %v814_v11, %v810_v7  ;;  %vm928_vm4 = vweird.f32 %v1733_v52  ;;  %vm768_vm5 = vweird.f32 %v1661_v43 }
 0x192   :  { %v1768_v24 = vmin.f32 %v228_v5, 16.0  ;;  %v895_v47 = vsel %vm1741_vm13, %v894_v55, %v890_v37  ;;  %v1149_v59 = vclamps-f32 %v856_v23, 1.0  ;;  %vm967_vm7 = vweird.f32 %v1738_v53  ;;  %vm1825_vm10 = vmor %vm927_vm1, %vm928_vm4 }
 0x193   :  { %v211_v26 = vpop.f32.mrf.mxu0  ;;  %v925_v29 = vmul.f32 %v1733_v52, %v924_v16  ;;  %v816_v63 = vmul.f32 %v815_v40, %v1664_v44  ;;  %vm767_vm8 = vweird.f32 %v1619_v60  ;;  %vm1817_vm9 = vcmp.eq.f32.partialorder %v971_v35, 8.507059e+37 }
 0x194   :  { %v230_v31 = vmul.f32 2.1237322e-06, %v1768_v24  ;;  %v241_v0 = vmul.f32 3.8918573e-05, %v1768_v24  ;;  %v1787_v22 = vadd.f32 %v1690_v20, %v211_v26  ;;  %v974_v1 = vor.u32 1.1754944e-38, %v973_v38  ;;  %vm1864_vm13 = vmor %vm767_vm8, %vm768_vm5 }
 0x195   :  { %v1208_v46 = vpop.eup %1207  ;;  %v926_v50 = vadd.f32 %v1733_v52, %v925_v29  ;;  %v896_v14 = vmul.f32 %v895_v47, %v1706_v28  ;;  %v983_v7 = vadd.f32 1.0, %v1149_v59  ;;  %v1148_v39 = vclamps-f32 %v816_v63, 1.0 }
 0x196   :  { %v231_v36 = vadd.f32 0.00028619796, %v230_v31  ;;  %v242_v49 = vadd.f32 0.001143296, %v241_v0  ;;  %v1805_v21 = vmul.f32 0.70710677, %v1787_v22  ;;  %v963_v45 = vmul.f32 %v1208_v46, %v1738_v53 }
 0x197   :  { %v930_v12 = vsel %vm1825_vm10, %v1733_v52, %v926_v50  ;;  %vm968_vm11 = vweird.f32 %v1208_v46  ;;  %v766_v37 = vadd.f32 %v1661_v43, %v765_v30  ;;  %v773_v35 = vand.u32 2147483648, %v1619_v60 }
 0x198   :  { %v232_v27 = vmul.f32 %v231_v36, %v1768_v24  ;;  %v243_v62 = vmul.f32 %v242_v49, %v1768_v24  ;;  %v268_v32 = vmul.f32 %v1805_v21, %v1805_v21  ;;  %v964_v2 = vsub.f32 1.0, %v963_v45  ;;  %vm969_vm12 = vmor %vm967_vm7, %vm968_vm11 }
 0x199   :  { %v935_v28 = vsel %vm1789_vm3, %v934_v17, %v930_v12  ;;  %v1150_v45 = vclamps-f32 %v896_v14, 1.0  ;;  %v770_v63 = vsel %vm1864_vm13, %v1661_v43, %v766_v37  ;;  %v774_v5 = vor.u32 1.1754944e-38, %v773_v35 }
 0x19a   :  { %v233_v44 = vadd.f32 0.0036580483, %v232_v27  ;;  %v244_v10 = vadd.f32 0.014752088, %v243_v62  ;;  %v1833_v16 = vmin.f32 %v268_v32, 16.0  ;;  %v965_v6 = vmul.f32 %v1208_v46, %v964_v2 }
 0x19b   :  { %v214_v55 = vpop.f32.mrf.mxu0  ;;  %v936_v33 = vmul.f32 %v935_v28, %v1758_v51  ;;  %v982_v62 = vadd.f32 1.0, %v1148_v39  ;;  %vm772_vm14 = vcmp.eq.f32.partialorder %v771_v42, 8.507059e+37  ;;  %v984_v60 = vadd.f32 1.0, %v1150_v45 }
 0x19c   :  { %v234_v48 = vmul.f32 %v233_v44, %v1768_v24  ;;  %v245_v26 = vmul.f32 %v244_v10, %v1768_v24  ;;  %v1838_v29 = vadd.f32 %v1690_v20, %v214_v55  ;;  %v270_v23 = vmul.f32 2.1237322e-06, %v1833_v16 }
 0x19d   :  { %v281_v52 = vmul.f32 3.8918573e-05, %v1833_v16  ;;  %v966_v11 = vadd.f32 %v1208_v46, %v965_v6  ;;  %v1151_v12 = vclamps-f32 %v936_v33, 1.0  ;;  %v775_v55 = vsel %vm772_vm14, %v774_v5, %v770_v63 }
 0x19e   :  { %v235_v31 = vadd.f32 0.05243302, %v234_v48  ;;  %v246_v0 = vadd.f32 0.112945676, %v245_v26  ;;  %v271_v38 = vadd.f32 0.00028619796, %v270_v23  ;;  %v991_v28 = vmul.f32 %v983_v7, %v1631_v15 }
 0x19f   :  { %v282_v40 = vadd.f32 0.001143296, %v281_v52  ;;  %v1849_v36 = vmul.f32 0.70710677, %v1838_v29  ;;  %v970_v49 = vsel %vm969_vm12, %v1208_v46, %v966_v11  ;;  %v649_v42 = vmul.f32 0.5, %v1568_v61 }
 0x1a0   :  { %v247_v50 = vmul.f32 %v246_v0, %v1768_v24  ;;  %v975_v17 = vsel %vm1817_vm9, %v974_v1, %v970_v49  ;;  %v236_v53 = vmul.f32 %v235_v31, %v1768_v24  ;;  %v272_v30 = vmul.f32 %v271_v38, %v1833_v16 }
 0x1a1   :  { %v283_v47 = vmul.f32 %v282_v40, %v1833_v16  ;;  %v308_v59 = vmul.f32 %v1849_v36, %v1849_v36  ;;  %v976_v51 = vmul.f32 %v975_v17, %v951_v13  ;;  %v650_v11 = vmul.f32 0.5, %v1597_v34 }
 0x1a2   :  { %v248_v27 = vadd.f32 0.4994258, %v247_v50  ;;  %v273_v32 = vadd.f32 0.0036580483, %v272_v30  ;;  %v237_v13 = vadd.f32 0.18741608, %v236_v53  ;;  %v776_v35 = vmul.f32 %v775_v55, %v1636_v8 }
 0x1a3   :  { %v284_v2 = vadd.f32 0.014752088, %v283_v47  ;;  %v1871_v3 = vmin.f32 %v308_v59, 16.0  ;;  %v217_v1 = vpop.f32.mrf.mxu0  ;;  %v1152_v39 = vclamps-f32 %v976_v51, 1.0  ;;  %v985_v61 = vadd.f32 1.0, %v1151_v12 }
 0x1a4   :  { %v249_v44 = vmul.f32 %v248_v27, %v1768_v24  ;;  %v1875_v10 = vadd.f32 %v1690_v20, %v217_v1  ;;  %v274_v20 = vmul.f32 %v273_v32, %v1833_v16  ;;  %v238_v31 = vmul.f32 %v237_v13, %v1768_v24  ;;  %v541_v1 = vpop.permute.xlu1 %540 }
 0x1a5   :  { %v285_v14 = vmul.f32 %v284_v2, %v1833_v16  ;;  %v310_v43 = vmul.f32 2.1237322e-06, %v1871_v3  ;;  %v321_v48 = vmul.f32 3.8918573e-05, %v1871_v3  ;;  %v986_v49 = vadd.f32 1.0, %v1152_v39 }
 0x1a6   :  { %v1881_v6 = vadd.f32 1.0, %v249_v44  ;;  %v1885_v26 = vmul.f32 0.70710677, %v1875_v10  ;;  %v275_v50 = vadd.f32 0.05243302, %v274_v20  ;;  %v992_v34 = vmul.f32 %v984_v60, %v1639_v19 }
 0x1a7   :  { %v286_v23 = vadd.f32 0.112945676, %v285_v14  ;;  %v311_v52 = vadd.f32 0.00028619796, %v310_v43  ;;  %v322_v38 = vadd.f32 0.001143296, %v321_v48  ;;  %v990_v15 = vmul.f32 %v982_v62, %v1584_v18 }
 0x1a8   :  { %1209 = vrcp.f32 %v1881_v6  ;;  %v348_v40 = vmul.f32 %v1885_v26, %v1885_v26  ;;  %v994_v45 = vmul.f32 %v986_v49, %v650_v11  ;;  %v239_v53 = vadd.f32 1.1283791, %v238_v31 }
 0x1a9   :  { %v287_v0 = vmul.f32 %v286_v23, %v1833_v16  ;;  %v312_v37 = vmul.f32 %v311_v52, %v1871_v3  ;;  %v323_v24 = vmul.f32 %v322_v38, %v1871_v3  ;;  %v1147_v30 = vclamps-f32 %v776_v35, 1.0 }
 0x1aa   :  { %v1901_v33 = vmin.f32 %v348_v40, 16.0  ;;  %v715_v47 = vadd.f32 0.014752088, %v1647_v56  ;;  %1023 = vmatpush.msra.mxu3 %v994_v45  ;;  %v993_v18 = vmul.f32 %v985_v61, %v649_v42  ;;  %v260_v63 = vand.u32 2147483647, %v1881_v6 }
 0x1ab   :  { %v288_v17 = vadd.f32 0.4994258, %v287_v0  ;;  %v313_v7 = vadd.f32 0.0036580483, %v312_v37  ;;  %v324_v46 = vadd.f32 0.014752088, %v323_v24  ;;  %v619_v51 = vpop.f32.mrf.mxu0  ;;  %v276_v32 = vmul.f32 %v275_v50, %v1833_v16 }
 0x1ac   :  { %v350_v27 = vmul.f32 2.1237322e-06, %v1901_v33  ;;  %v361_v19 = vmul.f32 3.8918573e-05, %v1901_v33  ;;  %1024 = vmatpush.msra.mxu3 %v993_v18  ;;  %v1915_v14 = vadd.f32 %v619_v51, %v541_v1  ;;  %v716_v43 = vmul.f32 %v715_v47, %v1523_v4  ;;  %v396_v1 = vld [vmem:[%s2080_s5] sm:$0xff] }
 0x1ad   :  { %v289_v8 = vmul.f32 %v288_v17, %v1833_v16  ;;  %v314_v56 = vmul.f32 %v313_v7, %v1871_v3  ;;  %v325_v5 = vmul.f32 %v324_v46, %v1871_v3  ;;  %vm256_vm15 = vweird.f32 %v1881_v6 }
 0x1ae   :  { %v1210_v59 = vpop.eup %1209  ;;  %v351_v44 = vadd.f32 0.00028619796, %v350_v27  ;;  %v362_v12 = vadd.f32 0.001143296, %v361_v19  ;;  %v262_v55 = vand.u32 2147483648, %v1881_v6  ;;  %1025 = vmatpush.msra.mxu3 %v992_v34  ;;  %v981_v39 = vadd.f32 1.0, %v1147_v30 }
 0x1af   :  { %v252_v62 = vmul.f32 %v1210_v59, %v1881_v6  ;;  %v1910_v2 = vadd.f32 1.0, %v289_v8  ;;  %v326_v48 = vadd.f32 0.112945676, %v325_v5  ;;  %vm257_vm1 = vweird.f32 %v1210_v59 }
 0x1b0   :  { %v352_v23 = vmul.f32 %v351_v44, %v1901_v33  ;;  %v363_v52 = vmul.f32 %v362_v12, %v1901_v33  ;;  %vm1922_vm2 = vcmp.eq.f32.partialorder %v260_v63, 8.507059e+37  ;;  %v277_v42 = vadd.f32 0.18741608, %v276_v32  ;;  %1026 = vmatpush.msra.mxu3 %v991_v28  ;;  %vm258_vm3 = vmor %vm256_vm15, %vm257_vm1  ;;  %v397_v32 = vld [vmem:[%s2080_s5 + $0x8] sm:$0xff]  ;;  %s1111_s5 = sshll.u32 %s1251_s8, 4  ;;  %s1112_s5 = int_to_ptr.vmem [resolvable:$true] %s1111_s5 }
 0x1b1   :  { %v253_v13 = vsub.f32 1.0, %v252_v62  ;;  %1211 = vrcp.f32 %v1910_v2  ;;  %v315_v11 = vadd.f32 0.05243302, %v314_v56  ;;  %v327_v31 = vmul.f32 %v326_v48, %v1871_v3  ;;  %429 = vmatpush.msra.mxu1 %v397_v32 }
 0x1b2   :  { %v353_v37 = vadd.f32 0.0036580483, %v352_v23  ;;  %v364_v35 = vadd.f32 0.014752088, %v363_v52  ;;  %v1928_v38 = vmul.f32 0.70710677, %v1915_v14  ;;  %1027 = vmatpush.msra.mxu3 %v990_v15  ;;  %v989_v61 = vmul.f32 %v981_v39, %v1577_v9 }
 0x1b3   :  { %v254_v20 = vmul.f32 %v1210_v59, %v253_v13  ;;  %v263_v40 = vor.u32 1.1754944e-38, %v262_v55  ;;  %v328_v49 = vadd.f32 0.4994258, %v327_v31  ;;  %v717_v50 = vadd.f32 0.112945676, %v716_v43  ;;  %430 = vmatpush.msra.mxu1 %v396_v1 }
 0x1b4   :  { %v354_v7 = vmul.f32 %v353_v37, %v1901_v33  ;;  %v365_v28 = vmul.f32 %v364_v35, %v1901_v33  ;;  %v659_v24 = vmul.f32 %v1928_v38, %v1928_v38  ;;  %v708_v45 = vadd.f32 0.18741608, %v1605_v41  ;;  %1028 = vmatpush.msra.mxu3 %v989_v61 }
 0x1b5   :  { %v255_v0 = vadd.f32 %v1210_v59, %v254_v20  ;;  %v240_v6 = vmul.f32 %v239_v53, %v1736_v58  ;;  %v278_v9 = vmul.f32 %v277_v42, %v1833_v16  ;;  %v316_v30 = vmul.f32 %v315_v11, %v1871_v3 }
 0x1b6   :  { %v329_v47 = vmul.f32 %v328_v49, %v1871_v3  ;;  %v302_v19 = vand.u32 2147483648, %v1910_v2  ;;  %v718_v41 = vmul.f32 %v717_v50, %v1523_v4  ;;  %v355_v53 = vadd.f32 0.05243302, %v354_v7 }
 0x1b7   :  { %v1212_v17 = vpop.eup %1211  ;;  %v259_v34 = vsel %vm258_vm3, %v1210_v59, %v255_v0  ;;  %v366_v59 = vadd.f32 0.112945676, %v365_v28  ;;  %v1950_v51 = vmin.f32 %v659_v24, 16.0  ;;  %v300_v16 = vand.u32 2147483647, %v1910_v2 }
 0x1b8   :  { %v264_v8 = vsel %vm1922_vm2, %v263_v40, %v259_v34  ;;  %v292_v15 = vmul.f32 %v1212_v17, %v1910_v2  ;;  %v1947_v58 = vadd.f32 1.0, %v329_v47  ;;  %vm297_vm4 = vweird.f32 %v1212_v17 }
 0x1b9   :  { %v265_v46 = vmul.f32 %v264_v8, %v240_v6  ;;  %v367_v18 = vmul.f32 %v366_v59, %v1901_v33  ;;  %v719_v63 = vadd.f32 0.4994258, %v718_v41  ;;  %v709_v56 = vmul.f32 %v708_v45, %v1523_v4 }
 0x1ba   :  { %v293_v27 = vsub.f32 1.0, %v292_v15  ;;  %v279_v5 = vadd.f32 1.1283791, %v278_v9  ;;  %v317_v44 = vadd.f32 0.18741608, %v316_v30  ;;  %1213 = vrcp.f32 %v1947_v58 }
 0x1bb   :  { %vm296_vm5 = vweird.f32 %v1910_v2  ;;  %v303_v13 = vor.u32 1.1754944e-38, %v302_v19  ;;  %v368_v43 = vadd.f32 0.4994258, %v367_v18  ;;  %v356_v55 = vmul.f32 %v355_v53, %v1901_v33 }
 0x1bc   :  { %v294_v62 = vmul.f32 %v1212_v17, %v293_v27  ;;  %vm298_vm7 = vmor %vm296_vm5, %vm297_vm4  ;;  %v661_v48 = vmul.f32 2.1237322e-06, %v1950_v51  ;;  %v720_v39 = vmul.f32 %v719_v63, %v1523_v4  ;;  %v1129_v20 = vclamps-f32 %v265_v46, 1.0 }
 0x1bd   :  { %vm301_vm8 = vcmp.eq.f32.partialorder %v300_v16, 8.507059e+37  ;;  %v369_v52 = vmul.f32 %v368_v43, %v1901_v33  ;;  %v280_v60 = vmul.f32 %v279_v5, %v1805_v21  ;;  %v318_v2 = vmul.f32 %v317_v44, %v1871_v3 }
 0x1be   :  { %v295_v12 = vadd.f32 %v1212_v17, %v294_v62  ;;  %v1968_v11 = vadd.f32 1.0, %v720_v39  ;;  %v710_v31 = vadd.f32 1.1283791, %v709_v56  ;;  %v388_v37 = vadd.f32 1.0, %v1129_v20 }
 0x1bf   :  { %v1970_v0 = vadd.f32 1.0, %v369_v52  ;;  %v357_v4 = vadd.f32 0.18741608, %v356_v55  ;;  %v662_v49 = vadd.f32 0.00028619796, %v661_v48  ;;  %v220_v61 = vmul.f32 0.5, %v1711_v25 }
 0x1c0   :  { %v299_v23 = vsel %vm298_vm7, %v1212_v17, %v295_v12  ;;  %v1214_v35 = vpop.eup %1213  ;;  %1215 = vrcp.f32 %v1968_v11  ;;  %v672_v21 = vmul.f32 3.8918573e-05, %v1950_v51  ;;  %v319_v3 = vadd.f32 1.1283791, %v318_v2 }
 0x1c1   :  { %v304_v42 = vsel %vm301_vm8, %v303_v13, %v299_v23  ;;  %v332_v50 = vmul.f32 %v1214_v35, %v1947_v58  ;;  %1217 = vrcp.f32 %v1970_v0  ;;  %v340_v17 = vand.u32 2147483647, %v1947_v58 }
 0x1c2   :  { %v305_v40 = vmul.f32 %v304_v42, %v280_v60  ;;  %v1979_v34 = vmul.f32 %v710_v31, %v1508_v57  ;;  %v342_v28 = vand.u32 2147483648, %v1947_v58  ;;  %v392_v24 = vmul.f32 %v388_v37, %v220_v61 }
 0x1c3   :  { %v333_v7 = vsub.f32 1.0, %v332_v50  ;;  %v221_v45 = vmul.f32 0.5, %v1787_v22  ;;  %v358_v25 = vmul.f32 %v357_v4, %v1901_v33  ;;  %v663_v6 = vmul.f32 %v662_v49, %v1950_v51 }
 0x1c4   :  { %v1130_v8 = vclamps-f32 %v305_v40, 1.0  ;;  %v222_v15 = vmul.f32 0.5, %v1838_v29  ;;  %vm337_vm9 = vweird.f32 %v1214_v35  ;;  %1133 = vmatmul.msk.f32.vlgmr.msra.gmra.mxu1 %vm402_vm6, %v392_v24  ;;  %v673_v30 = vadd.f32 0.001143296, %v672_v21 }
 0x1c5   :  { %v334_v9 = vmul.f32 %v1214_v35, %v333_v7  ;;  %v320_v47 = vmul.f32 %v319_v3, %v1849_v36  ;;  %vm336_vm10 = vweird.f32 %v1947_v58  ;;  %vm1989_vm11 = vcmp.eq.f32.partialorder %v340_v17, 8.507059e+37 }
 0x1c6   :  { %v1216_v57 = vpop.eup %1215  ;;  %v389_v22 = vadd.f32 1.0, %v1130_v8  ;;  %v343_v27 = vor.u32 1.1754944e-38, %v342_v28  ;;  %v674_v19 = vmul.f32 %v673_v30, %v1950_v51  ;;  %vm338_vm12 = vmor %vm336_vm10, %vm337_vm9  ;;  %v359_v41 = vadd.f32 1.1283791, %v358_v25 }
 0x1c7   :  { %v1218_v33 = vpop.eup %1217  ;;  %v335_v46 = vadd.f32 %v1214_v35, %v334_v9  ;;  %v723_v29 = vmul.f32 %v1216_v57, %v1968_v11  ;;  %v664_v18 = vadd.f32 0.0036580483, %v663_v6  ;;  %v731_v36 = vand.u32 2147483647, %v1968_v11 }
 0x1c8   :  { %v372_v53 = vmul.f32 %v1218_v33, %v1970_v0  ;;  %v393_v16 = vmul.f32 %v389_v22, %v221_v45  ;;  %v675_v63 = vadd.f32 0.014752088, %v674_v19  ;;  %v382_v56 = vand.u32 2147483648, %v1970_v0 }
 0x1c9   :  { %v339_v58 = vsel %vm338_vm12, %v1214_v35, %v335_v46  ;;  %v724_v62 = vsub.f32 1.0, %v723_v29  ;;  %v733_v5 = vand.u32 2147483648, %v1968_v11  ;;  %vm728_vm13 = vweird.f32 %v1216_v57 }
 0x1ca   :  { %v344_v32 = vsel %vm1989_vm11, %v343_v27, %v339_v58  ;;  %v373_v1 = vsub.f32 1.0, %v372_v53  ;;  %v676_v13 = vmul.f32 %v675_v63, %v1950_v51  ;;  %vm377_vm14 = vweird.f32 %v1218_v33  ;;  %v995_v58 = vld [vmem:[%s2086_s11] sm:$0xff] }
 0x1cb   :  { %v345_v44 = vmul.f32 %v344_v32, %v320_v47  ;;  %v725_v12 = vmul.f32 %v1216_v57, %v724_v62  ;;  %v380_v55 = vand.u32 2147483647, %v1970_v0  ;;  %vm727_vm15 = vweird.f32 %v1968_v11  ;;  %v1057_v62 = vld [vmem:[%s2088_s13 + $0x38] sm:$0xff]  ;;  %v1054_v63 = vld [vmem:[%s2088_s13 + $0x20] sm:$0xff] }
 0x1cc   :  { %v374_v43 = vmul.f32 %v1218_v33, %v373_v1  ;;  %vm376_vm1 = vweird.f32 %v1970_v0  ;;  %1134 = vmatmul.msk.f32.gmra.mxu1 %vm402_vm6, %v393_v16  ;;  %v677_v20 = vadd.f32 0.112945676, %v676_v13  ;;  %v665_v52 = vmul.f32 %v664_v18, %v1950_v51  ;;  %vm729_vm2 = vmor %vm727_vm15, %vm728_vm13  ;;  %v1055_v16 = vld [vmem:[%s2088_s13 + $0x28] sm:$0xff]  ;;  %v1053_v32 = vld [vmem:[%s2088_s13 + $0x18] sm:$0xff]  ;;  %v1002_v13 = vpop.permute.xlu0 %1001 }
 0x1cd   :  { %v726_v48 = vadd.f32 %v1216_v57, %v725_v12  ;;  %v1131_v39 = vclamps-f32 %v345_v44, 1.0  ;;  %vm732_vm3 = vcmp.eq.f32.partialorder %v731_v36, 8.507059e+37  ;;  %v734_v60 = vor.u32 1.1754944e-38, %v733_v5  ;;  %vm378_vm4 = vmor %vm376_vm1, %vm377_vm14  ;;  %1082 = vmatpush.msrb.mxu1 %v1057_v62  ;;  %v1052_v1 = vld [vmem:[%s2088_s13 + $0x10] sm:$0xff]  ;;  %v1050_v5 = vld [vmem:[%s2088_s13] sm:$0xff] }
 0x1ce   :  { %v375_v23 = vadd.f32 %v1218_v33, %v374_v43  ;;  %v383_v42 = vor.u32 1.1754944e-38, %v382_v56  ;;  %v678_v37 = vmul.f32 %v677_v20, %v1950_v51  ;;  %v360_v11 = vmul.f32 %v359_v41, %v1885_v26  ;;  %v1051_v56 = vld [vmem:[%s2088_s13 + $0x8] sm:$0xff]  ;;  %v1182_v12 = vld [vmem:[%s2081_s6] ss:$0 sm:$0xff] }
 0x1cf   :  { %v730_v2 = vsel %vm729_vm2, %v1216_v57, %v726_v48  ;;  %v390_v31 = vadd.f32 1.0, %v1131_v39  ;;  %vm381_vm5 = vcmp.eq.f32.partialorder %v380_v55, 8.507059e+37  ;;  %v666_v21 = vadd.f32 0.05243302, %v665_v52 }
 0x1d0   :  { %v379_v0 = vsel %vm378_vm4, %v1218_v33, %v375_v23  ;;  %v735_v35 = vsel %vm732_vm3, %v734_v60, %v730_v2  ;;  %v679_v61 = vadd.f32 0.4994258, %v678_v37  ;;  %v644_v28 = vmul.f32 0.5, %v1500_v54  ;;  %v1007_v23 = vpop.permute.xlu2 %1006 }
 0x1d1   :  { %v384_v40 = vsel %vm381_vm5, %v383_v42, %v379_v0  ;;  %v736_v4 = vmul.f32 %v735_v35, %v1979_v34  ;;  %v394_v49 = vmul.f32 %v390_v31, %v222_v15  ;;  %v667_v45 = vmul.f32 %v666_v21, %v1950_v51 }
 0x1d2   :  { %v385_v50 = vmul.f32 %v384_v40, %v360_v11  ;;  %v680_v17 = vmul.f32 %v679_v61, %v1950_v51  ;;  %v223_v6 = vmul.f32 0.5, %v1875_v10  ;;  %v1058_v61 = vld [vmem:[%s2089_s14] sm:$0xff] }
 0x1d3   :  { %v1146_v3 = vclamps-f32 %v736_v4, 1.0  ;;  %v668_v15 = vadd.f32 0.18741608, %v667_v45  ;;  %v1061_v45 = vld [vmem:[%s2089_s14 + $0x18] sm:$0xff] }
 0x1d4   :  { %v1132_v7 = vclamps-f32 %v385_v50, 1.0  ;;  %1135 = vmatmul.msk.f32.gmra.mxu1 %vm402_vm6, %v394_v49  ;;  %v681_v26 = vadd.f32 1.0, %v680_v17 }
 0x1d5   :  { %v980_v24 = vadd.f32 1.0, %v1146_v3  ;;  %v669_v30 = vmul.f32 %v668_v15, %v1950_v51  ;;  %v643_v51 = vmul.f32 0.5, %v1915_v14  ;;  %v1056_v14 = vld [vmem:[%s2088_s13 + $0x30] sm:$0xff]  ;;  %v1059_v3 = vld [vmem:[%s2089_s14 + $0x8] sm:$0xff] }
 0x1d6   :  { %v391_v25 = vadd.f32 1.0, %v1132_v7  ;;  %1219 = vrcp.f32 %v681_v26  ;;  %v693_v47 = vand.u32 2147483648, %v681_v26  ;;  %v691_v33 = vand.u32 2147483647, %v681_v26  ;;  %1083 = vmatpush.msrb.mxu1 %v1056_v14 }
 0x1d7   :  { %v988_v34 = vmul.f32 %v980_v24, %v644_v28  ;;  %v670_v59 = vadd.f32 1.1283791, %v669_v30  ;;  %vm687_vm8 = vweird.f32 %v681_v26  ;;  %v1060_v28 = vld [vmem:[%s2089_s14 + $0x10] sm:$0xff] }
 0x1d8   :  { %v395_v8 = vmul.f32 %v391_v25, %v223_v6  ;;  %v694_v10 = vor.u32 1.1754944e-38, %v693_v47  ;;  %vm692_vm10 = vcmp.eq.f32.partialorder %v691_v33, 8.507059e+37  ;;  %1084 = vmatpush.msrb.mxu1 %v1055_v16 }
 0x1d9   :  { %1029 = vmatpush.msra.mxu3 %v988_v34  ;;  %v671_v27 = vmul.f32 %v670_v59, %v1928_v38  ;;  %v996_v38 = vld [vmem:[%s2086_s11 + $0x8] sm:$0xff] }
 0x1da   :  { %1085 = vmatpush.msrb.mxu1 %v1054_v63 }
 0x1dc   :  { %v1220_v9 = vpop.eup %1219  ;;  %1136 = vmatmul.msk.f32.gmra.mxu1 %vm402_vm6, %v395_v8 }
 0x1dd   :  { %v683_v54 = vmul.f32 %v1220_v9, %v681_v26  ;;  %vm688_vm7 = vweird.f32 %v1220_v9  ;;  %1086 = vmatpush.msrb.mxu1 %v1053_v32 }
 0x1de   :  { %vm689_vm9 = vmor %vm687_vm8, %vm688_vm7 }
 0x1df   :  { %v684_v57 = vsub.f32 1.0, %v683_v54  ;;  %1087 = vmatpush.msrb.mxu1 %v1052_v1 }
 0x1e1   :  { %v685_v22 = vmul.f32 %v1220_v9, %v684_v57  ;;  %1088 = vmatpush.msrb.mxu1 %v1051_v56 }
 0x1e3   :  { %v686_v46 = vadd.f32 %v1220_v9, %v685_v22  ;;  %1089 = vmatpush.msrb.mxu1 %v1050_v5 }
 0x1e5   :  { %v690_v29 = vsel %vm689_vm9, %v1220_v9, %v686_v46 }
 0x1e6   :  { %v695_v19 = vsel %vm692_vm10, %v694_v10, %v690_v29 }
 0x1e7   :  { %v696_v41 = vmul.f32 %v695_v19, %v671_v27 }
 0x1e9   :  { %v1145_v53 = vclamps-f32 %v696_v41, 1.0 }
 0x1eb   :  { %v979_v18 = vadd.f32 1.0, %v1145_v53 }
 0x1ed   :  { %v987_v36 = vmul.f32 %v979_v18, %v643_v51 }
 0x1ef   :  { %1030 = vmatpush.msra.mxu3 %v987_v36 }
 0x1f0   :  { %1153 = vmatmul.msk.f32.vlgmr.msra.gmra.mxu3 %vm55_vm0, %v995_v58 }
 0x1f1   :  { %1161 = vmatpush.msrb.mxu3 %v1057_v62 }
 0x1f3   :  { %1162 = vmatpush.msrb.mxu3 %v1056_v14 }
 0x1f5   :  { %1163 = vmatpush.msrb.mxu3 %v1055_v16 }
 0x1f7   :  { %1164 = vmatpush.msrb.mxu3 %v1054_v63 }
 0x1f8   :  { %1154 = vmatmul.msk.f32.gmra.mxu3 %vm55_vm0, %v996_v38 }
 0x1f9   :  { %1165 = vmatpush.msrb.mxu3 %v1053_v32 }
 0x1fb   :  { %1166 = vmatpush.msrb.mxu3 %v1052_v1 }
 0x1fd   :  { %1167 = vmatpush.msrb.mxu3 %v1051_v56 }
 0x1ff   :  { %1168 = vmatpush.msrb.mxu3 %v1050_v5 }
 0x241   :  { %v432_v44 = vpop.f32.mrf.mxu1 }
 0x242   :  { %v433_v55 = vadd.f32 %v1182_v12, %v432_v44 }
 0x249   :  { %v435_v20 = vpop.f32.mrf.mxu1 }
 0x24a   :  { %v436_v60 = vadd.f32 %v1182_v12, %v435_v20 }
 0x251   :  { %v438_v31 = vpop.f32.mrf.mxu1 }
 0x252   :  { %v439_v37 = vadd.f32 %v1182_v12, %v438_v31 }
 0x259   :  { %v441_v35 = vpop.f32.mrf.mxu1 }
 0x25a   :  { %v442_v40 = vadd.f32 %v1182_v12, %v441_v35 }
 0x273   :  { %v1032_v43 = vpop.f32.mrf.mxu3 }
 0x274   :  { %v1033_v48 = vadd.f32 %v1032_v43, %v1002_v13 }
 0x276   :  { %v1046_v39 = vadd.f32 %v1033_v48, %v433_v55  ;;  %1040 = vrot.lane.b32.xlu1 %v1033_v48, %s1247_s22 }
 0x278   :  { %1155 = vmatmul.msk.f32.vlgmr.msrb.gmra.mxu1 %vm55_vm0, %v1046_v39 }
 0x27b   :  { %v1035_v52 = vpop.f32.mrf.mxu3 }
 0x27c   :  { %v1036_v42 = vadd.f32 %v1035_v52, %v1007_v23 }
 0x27e   :  { %v1047_v2 = vadd.f32 %v1036_v42, %v436_v60  ;;  %1042 = vrot.lane.b32.xlu0 %v1036_v42, %s1247_s22 }
 0x280   :  { %1156 = vmatmul.msk.f32.vlgmr.msrb.gmra.mxu3 %vm55_vm0, %v1047_v2 }
 0x2e8   :  { %v1041_v11 = vpop.permute.xlu1 %1040 }
 0x2e9   :  { %v1048_v0 = vadd.f32 %v1041_v11, %v439_v37 }
 0x2eb   :  { %1157 = vmatmul.msk.f32.gmra.mxu3 %vm55_vm0, %v1048_v0 }
 0x2f0   :  { %v1043_v4 = vpop.permute.xlu0 %1042 }
 0x2f1   :  { %v1049_v49 = vadd.f32 %v1043_v4, %v442_v40 }
 0x2f3   :  { %1158 = vmatmul.msk.f32.gmra.mxu3 %vm55_vm0, %v1049_v49 }
 0x2f5   :  { %v1091_v50 = vpop.f32.mrf.mxu1 }
 0x2f6   :  { %v1092_v21 = vadd.f32 %v1091_v50, %v1058_v61 }
 0x2f8   :  { %1103 = vst [vmem:[#allocation2] sm:$0xff] %v1092_v21 }
 0x303   :  { %v1094_v17 = vpop.f32.mrf.mxu3 }
 0x304   :  { %v1095_v7 = vadd.f32 %v1094_v17, %v1059_v3 }
 0x306   :  { %1104 = vst [vmem:[#allocation2 + $0x8] sm:$0xff] %v1095_v7 }
 0x36e   :  { %v1097_v24 = vpop.f32.mrf.mxu3 }
 0x36f   :  { %v1098_v26 = vadd.f32 %v1097_v24, %v1060_v28 }
 0x371   :  { %1105 = vst [vmem:[#allocation2 + $0x10] sm:$0xff] %v1098_v26 }
 0x376   :  { %v1100_v25 = vpop.f32.mrf.mxu3 }
 0x377   :  { %v1101_v6 = vadd.f32 %v1100_v25, %v1061_v45 }
 0x379   :  { %1106 = vst [vmem:[#allocation2 + $0x18] sm:$0xff] %v1101_v6 }
 0x37a   :  { %1119 = dma.vmem_to_hbm [thread:$0]  %s1112_s5, 512, %s1114_s20, [#allocation3], %s1252_s24, %s1252_s24, %s1253_s25  }
 0x37b   :  { %1245 = dma.done.wait [#allocation3], 512  }
 0x37c   :  { %1246 = vsyncadd [#allocation3], 4294966784 }
 0x37d   :  { %1124 = vsyncpa [#allocation3], 1 }

</bundles_post_ra>
